<compile_context>
chip_gen: v7x
topology: tpu7x:2x2x1
jax: 0.10.0
libtpu: 0.0.40
codegen_flags: <defaults>
</compile_context>

<pallas_src>
import math

import jax
import jax.numpy as jnp
from jax import lax
from jax.experimental import pallas as pl
from jax.experimental.pallas import tpu as pltpu


# ----------------------------------------------------------------------------
# Host-side helpers (trace-time constants, tiny tensors)
# ----------------------------------------------------------------------------
def _interp_matrix(out_size, in_size):
    """(out_size, in_size) bilinear interpolation matrix, align_corners=True."""
    if out_size == 1:
        src = jnp.zeros((1,), jnp.float32)
    else:
        src = jnp.arange(out_size, dtype=jnp.float32) * ((in_size - 1) / (out_size - 1))
    i0 = jnp.clip(jnp.floor(src).astype(jnp.int32), 0, in_size - 1)
    i1 = jnp.minimum(i0 + 1, in_size - 1)
    frac = src - i0.astype(jnp.float32)
    rows = jnp.arange(out_size)
    a = jnp.zeros((out_size, in_size), jnp.float32)
    a = a.at[rows, i0].add(1.0 - frac)
    a = a.at[rows, i1].add(frac)
    return a


def _edge_masks(H, W):
    """(9, H*W) f32 validity masks for the 3x3 taps under zero padding."""
    hh = jnp.arange(H).reshape(H, 1)
    ww = jnp.arange(W).reshape(1, W)
    masks = []
    for kh in range(3):
        for kw in range(3):
            dh, dw = kh - 1, kw - 1
            valid = ((hh + dh >= 0) & (hh + dh < H) &
                     (ww + dw >= 0) & (ww + dw < W))
            masks.append(valid.reshape(H * W))
    return jnp.stack(masks, axis=0).astype(jnp.float32)


def _pick_batch_block(n, max_nb=8):
    """Largest divisor of n (<= max_nb), preferring ones that keep grid >= 2
    so both TensorCores get work on v7x."""
    divisors = [d for d in range(1, min(n, max_nb) + 1) if n % d == 0]
    multi = [d for d in divisors if n // d >= 2]
    return max(multi) if multi else max(divisors)


# ----------------------------------------------------------------------------
# FeatureMatcher forward: fused upsample + concat + 3x3 conv (2C->1) + sigmoid
# ----------------------------------------------------------------------------
def feature_matcher_forward(x_high, x_low, weight, bias, *, dma_dtype=None):
    N, C, H, W = x_high.shape
    Nl, Cl, Hl, Wl = x_low.shape
    assert (N, C) == (Nl, Cl) and weight.shape == (1, 2 * C, 3, 3)
    HW, HWl = H * W, Hl * Wl
    out_dtype = x_high.dtype

    NB = _pick_batch_block(N)          # images per grid step
    R = NB * C                         # rows per stream per step (sublane-folded)

    # Upsample as a single matmul over the flattened spatial axis:
    #   x_up_flat = x_low_flat @ kron(A_h, A_w)^T
    a_h = _interp_matrix(H, Hl)                        # (H, Hl)
    a_w = _interp_matrix(W, Wl)                        # (W, Wl)
    m_t = jnp.kron(a_h, a_w).T                         # (HWl, HW)

    # Per-tap conv weights with the zero-padding edge mask folded in, laid out
    # to match the in-kernel working slab [NB x high-channels | NB x low-channels].
    mask = _edge_masks(H, W)                           # (9, HW)
    w2 = weight.astype(jnp.float32).reshape(2 * C, 9)  # rows: [high C | low C]
    wm_h = w2[:C].T[:, :, None] * mask[:, None, :]     # (9, C, HW)
    wm_l = w2[C:].T[:, :, None] * mask[:, None, :]     # (9, C, HW)
    wm = jnp.concatenate(
        [jnp.tile(wm_h, (1, NB, 1)), jnp.tile(wm_l, (1, NB, 1))], axis=1)  # (9, 2R, HW)
    # TODO(synk): for production channel counts keep wm at (9, 2C, HW), tile C on an
    # "arbitrary" grid axis and tile HW with a 1-row halo so blocks fit v7x's 64 MiB VMEM.

    # 0/1 selection matrix: sums each image's 2C channel rows into one output row.
    rows = jnp.arange(2 * R)
    img_of_row = jnp.where(rows < R, rows // C, (rows - R) // C)
    sel = (img_of_row[None, :] == jnp.arange(NB)[:, None]).astype(jnp.float32)  # (NB, 2R)

    b_flat = bias.reshape(-1).astype(jnp.float32)      # (1,)

    # Flat, lane-dense inputs; optional bf16 DMA (kernel upcasts to f32 after load).
    xh_flat = x_high.reshape(N * C, HW)
    xl_flat = x_low.reshape(N * C, HWl)
    if dma_dtype is not None:
        xh_flat = xh_flat.astype(dma_dtype)
        xl_flat = xl_flat.astype(dma_dtype)

    # Static roll amounts per tap: rolled_t[p] = x_flat[(p + off_t) mod HW].
    shifts = tuple((-((kh - 1) * W + (kw - 1))) % HW
                   for kh in range(3) for kw in range(3))

    def kernel(wm_ref, mt_ref, sel_ref, b_ref, xh_ref, xl_ref, o_ref):
        f32 = jnp.float32
        xh = xh_ref[...].astype(f32)                                    # (R, HW)
        xl = xl_ref[...].astype(f32)                                    # (R, HWl)

        # Fused align_corners bilinear upsample: one small MXU matmul.
        xl_up = jnp.dot(xl, mt_ref[...], preferred_element_type=f32)   # (R, HW)

        # One sublane-dense working slab: [high rows | upsampled low rows].
        x = jnp.concatenate([xh, xl_up], axis=0)                        # (2R, HW)

        acc = jnp.zeros_like(x)
        for t in range(9):                    # 3x3 taps: one roll + one FMA each
            shift = shifts[t]
            rolled = pltpu.roll(x, shift, 1) if shift else x            # XLU slot
            acc = acc + rolled * wm_ref[t]                              # VPU FMA

        # Per-image channel reduction via a 0/1 matmul (MXU is otherwise idle;
        # this replaces a strided sublane reduction) -> dense (NB, HW) store.
        out = jnp.dot(sel_ref[...], acc, preferred_element_type=f32) + b_ref[0]
        o_ref[...] = jax.nn.sigmoid(out).astype(o_ref.dtype)            # EUP

    out_flat = pl.pallas_call(
        kernel,
        out_shape=jax.ShapeDtypeStruct((N, HW), out_dtype),
        grid=(N // NB,),
        in_specs=[
            pl.BlockSpec((9, 2 * R, HW), lambda n: (0, 0, 0)),          # masked tap weights
            pl.BlockSpec((HWl, HW), lambda n: (0, 0)),                  # upsample matrix
            pl.BlockSpec((NB, 2 * R), lambda n: (0, 0)),                # channel-sum selector
            pl.BlockSpec(memory_space=pltpu.MemorySpace.SMEM),          # bias (scalar)
            pl.BlockSpec((R, HW), lambda n: (n, 0)),                    # x_high rows
            pl.BlockSpec((R, HWl), lambda n: (n, 0)),                   # x_low rows
        ],
        out_specs=pl.BlockSpec((NB, HW), lambda n: (n, 0)),
        compiler_params=pltpu.CompilerParams(
            dimension_semantics=("parallel",)),                         # both TCs on v7x
    )(wm, m_t, sel, b_flat, xh_flat, xl_flat)

    return out_flat.reshape(N, 1, H, W)


# ----------------------------------------------------------------------------
# Pure-JAX reference (only used for validation in __main__)
# ----------------------------------------------------------------------------
def _reference_upsample(x, out_h, out_w):
    N, C, Hi, Wi = x.shape

    def src(o, i):
        if o == 1:
            return jnp.zeros((o,), jnp.float32)
        return jnp.arange(o, dtype=jnp.float32) * ((i - 1) / (o - 1))

    hs, ws = src(out_h, Hi), src(out_w, Wi)
    h0 = jnp.floor(hs).astype(jnp.int32)
    w0 = jnp.floor(ws).astype(jnp.int32)
    h1 = jnp.minimum(h0 + 1, Hi - 1)
    w1 = jnp.minimum(w0 + 1, Wi - 1)
    ah = (hs - h0)[None, None, :, None]
    aw = (ws - w0)[None, None, None, :]
    x_h = x[:, :, h0, :] * (1.0 - ah) + x[:, :, h1, :] * ah
    return x_h[:, :, :, w0] * (1.0 - aw) + x_h[:, :, :, w1] * aw


if __name__ == "__main__":
    dim = 4
    N, H, W = 16, 16, 16
    Hl, Wl = 8, 8
    C2 = 2 * dim

    key = jax.random.PRNGKey(0)
    k1, k2, k3, k4 = jax.random.split(key, 4)

    x_high = jax.random.normal(k1, (N, dim, H, W), dtype=jnp.float32)
    x_low = jax.random.normal(k2, (N, dim, Hl, Wl), dtype=jnp.float32)

    # Deterministic Conv2d(2*dim, 1, 3, padding=1) init (PyTorch-style uniform bound).
    fan_in = C2 * 3 * 3
    bound = 1.0 / math.sqrt(fan_in)
    weight = jax.random.uniform(k3, (1, C2, 3, 3), jnp.float32, -bound, bound)
    bias = jax.random.uniform(k4, (1,), jnp.float32, -bound, bound)

    out = feature_matcher_forward(x_high, x_low, weight, bias)
    out = jax.block_until_ready(out)
    assert out.shape == (N, 1, H, W)

    # Reference: gather-based align_corners upsample + f32 conv + sigmoid.
    x_low_up = _reference_upsample(x_low, H, W)
    x_cat = jnp.concatenate([x_high, x_low_up], axis=1)
    ref = lax.conv_general_dilated(
        x_cat, weight, window_strides=(1, 1), padding=((1, 1), (1, 1)),
        dimension_numbers=("NCHW", "OIHW", "NCHW"),
        precision=lax.Precision.HIGHEST)
    ref = jax.nn.sigmoid(ref + bias[None, :, None, None])

    # Tolerance leaves headroom for MXU pass-rounding of the fused f32 upsample
    # matmul; any structural error (wrong tap/mask/channel/layout) is >= 1e-1.
    assert jnp.allclose(out, ref, atol=5e-3, rtol=0.0), "mismatch vs reference"

    print("KERNEL_OK")
</pallas_src>

<mosaic_0001>
module attributes {stable_mosaic.version = 11 : i64} {
  func.func @kernel(%arg0: i32, %arg1: memref<9x64x256xf32, #tpu.memory_space<vmem>>, %arg2: memref<64x256xf32, #tpu.memory_space<vmem>>, %arg3: memref<8x64xf32, #tpu.memory_space<vmem>>, %arg4: memref<1xf32, #tpu.memory_space<smem>>, %arg5: memref<32x256xf32, #tpu.memory_space<vmem>>, %arg6: memref<32x64xf32, #tpu.memory_space<vmem>>, %arg7: memref<8x256xf32, #tpu.memory_space<vmem>>) attributes {dimension_semantics = [#tpu.dimension_semantics<parallel>], iteration_bounds = array<i64: 2>, scalar_prefetch = 0 : i64, scratch_operands = 0 : i64, tpu.core_type = #tpu.core_type<tc>, window_params = [{pipeline_mode = #tpu.pipeline_mode<synchronous>, transform_indices = @transform_0, window_bounds = array<i64: 9, 64, 256>}, {pipeline_mode = #tpu.pipeline_mode<synchronous>, transform_indices = @transform_1, window_bounds = array<i64: 64, 256>}, {pipeline_mode = #tpu.pipeline_mode<synchronous>, transform_indices = @transform_2, window_bounds = array<i64: 8, 64>}, {transform_indices = @transform_3, window_bounds = array<i64: 1>}, {transform_indices = @transform_4, window_bounds = array<i64: 32, 256>}, {transform_indices = @transform_5, window_bounds = array<i64: 32, 64>}, {transform_indices = @transform_6, window_bounds = array<i64: 8, 256>}]} {
    %c0 = arith.constant 0 : index
    %c0_0 = arith.constant 0 : index
    %0 = vector.load %arg5[%c0, %c0_0] : memref<32x256xf32, #tpu.memory_space<vmem>>, vector<32x256xf32>
    %c0_1 = arith.constant 0 : index
    %c0_2 = arith.constant 0 : index
    %1 = vector.load %arg6[%c0_1, %c0_2] : memref<32x64xf32, #tpu.memory_space<vmem>>, vector<32x64xf32>
    %c0_3 = arith.constant 0 : index
    %c0_4 = arith.constant 0 : index
    %2 = vector.load %arg2[%c0_3, %c0_4] : memref<64x256xf32, #tpu.memory_space<vmem>>, vector<64x256xf32>
    %cst = arith.constant dense<0.000000e+00> : vector<32x256xf32>
    %3 = tpu.matmul %1, %2, %cst {dimension_numbers = #tpu.dot_dimension_numbers<[1], [0], [0], [1], [0, 0, 1, 1], [], []>} : vector<32x64xf32>, vector<64x256xf32>, vector<32x256xf32> -> vector<32x256xf32>
    %4 = tpu.concatenate %0, %3 in 0 : vector<32x256xf32>, vector<32x256xf32> -> vector<64x256xf32>
    %cst_5 = arith.constant 0.000000e+00 : f32
    %5 = vector.broadcast %cst_5 : f32 to vector<64x256xf32>
    %c17_i32 = arith.constant 17 : i32
    %6 = tpu.dynamic_rotate %4 by %c17_i32 dim 1 : vector<64x256xf32>, i32 -> vector<64x256xf32>
    %c0_6 = arith.constant 0 : index
    %c0_7 = arith.constant 0 : index
    %c0_8 = arith.constant 0 : index
    %7 = vector.load %arg1[%c0_6, %c0_7, %c0_8] : memref<9x64x256xf32, #tpu.memory_space<vmem>>, vector<1x64x256xf32>
    %8 = vector.shape_cast %7 : vector<1x64x256xf32> to vector<64x256xf32>
    %9 = arith.mulf %6, %8 : vector<64x256xf32>
    %10 = arith.addf %5, %9 : vector<64x256xf32>
    %c16_i32 = arith.constant 16 : i32
    %11 = tpu.dynamic_rotate %4 by %c16_i32 dim 1 : vector<64x256xf32>, i32 -> vector<64x256xf32>
    %c1 = arith.constant 1 : index
    %c0_9 = arith.constant 0 : index
    %c0_10 = arith.constant 0 : index
    %12 = vector.load %arg1[%c1, %c0_9, %c0_10] : memref<9x64x256xf32, #tpu.memory_space<vmem>>, vector<1x64x256xf32>
    %13 = vector.shape_cast %12 : vector<1x64x256xf32> to vector<64x256xf32>
    %14 = arith.mulf %11, %13 : vector<64x256xf32>
    %15 = arith.addf %10, %14 : vector<64x256xf32>
    %c15_i32 = arith.constant 15 : i32
    %16 = tpu.dynamic_rotate %4 by %c15_i32 dim 1 : vector<64x256xf32>, i32 -> vector<64x256xf32>
    %c2 = arith.constant 2 : index
    %c0_11 = arith.constant 0 : index
    %c0_12 = arith.constant 0 : index
    %17 = vector.load %arg1[%c2, %c0_11, %c0_12] : memref<9x64x256xf32, #tpu.memory_space<vmem>>, vector<1x64x256xf32>
    %18 = vector.shape_cast %17 : vector<1x64x256xf32> to vector<64x256xf32>
    %19 = arith.mulf %16, %18 : vector<64x256xf32>
    %20 = arith.addf %15, %19 : vector<64x256xf32>
    %c1_i32 = arith.constant 1 : i32
    %21 = tpu.dynamic_rotate %4 by %c1_i32 dim 1 : vector<64x256xf32>, i32 -> vector<64x256xf32>
    %c3 = arith.constant 3 : index
    %c0_13 = arith.constant 0 : index
    %c0_14 = arith.constant 0 : index
    %22 = vector.load %arg1[%c3, %c0_13, %c0_14] : memref<9x64x256xf32, #tpu.memory_space<vmem>>, vector<1x64x256xf32>
    %23 = vector.shape_cast %22 : vector<1x64x256xf32> to vector<64x256xf32>
    %24 = arith.mulf %21, %23 : vector<64x256xf32>
    %25 = arith.addf %20, %24 : vector<64x256xf32>
    %c4 = arith.constant 4 : index
    %c0_15 = arith.constant 0 : index
    %c0_16 = arith.constant 0 : index
    %26 = vector.load %arg1[%c4, %c0_15, %c0_16] : memref<9x64x256xf32, #tpu.memory_space<vmem>>, vector<1x64x256xf32>
    %27 = vector.shape_cast %26 : vector<1x64x256xf32> to vector<64x256xf32>
    %28 = arith.mulf %4, %27 : vector<64x256xf32>
    %29 = arith.addf %25, %28 : vector<64x256xf32>
    %c255_i32 = arith.constant 255 : i32
    %30 = tpu.dynamic_rotate %4 by %c255_i32 dim 1 : vector<64x256xf32>, i32 -> vector<64x256xf32>
    %c5 = arith.constant 5 : index
    %c0_17 = arith.constant 0 : index
    %c0_18 = arith.constant 0 : index
    %31 = vector.load %arg1[%c5, %c0_17, %c0_18] : memref<9x64x256xf32, #tpu.memory_space<vmem>>, vector<1x64x256xf32>
    %32 = vector.shape_cast %31 : vector<1x64x256xf32> to vector<64x256xf32>
    %33 = arith.mulf %30, %32 : vector<64x256xf32>
    %34 = arith.addf %29, %33 : vector<64x256xf32>
    %c241_i32 = arith.constant 241 : i32
    %35 = tpu.dynamic_rotate %4 by %c241_i32 dim 1 : vector<64x256xf32>, i32 -> vector<64x256xf32>
    %c6 = arith.constant 6 : index
    %c0_19 = arith.constant 0 : index
    %c0_20 = arith.constant 0 : index
    %36 = vector.load %arg1[%c6, %c0_19, %c0_20] : memref<9x64x256xf32, #tpu.memory_space<vmem>>, vector<1x64x256xf32>
    %37 = vector.shape_cast %36 : vector<1x64x256xf32> to vector<64x256xf32>
    %38 = arith.mulf %35, %37 : vector<64x256xf32>
    %39 = arith.addf %34, %38 : vector<64x256xf32>
    %c240_i32 = arith.constant 240 : i32
    %40 = tpu.dynamic_rotate %4 by %c240_i32 dim 1 : vector<64x256xf32>, i32 -> vector<64x256xf32>
    %c7 = arith.constant 7 : index
    %c0_21 = arith.constant 0 : index
    %c0_22 = arith.constant 0 : index
    %41 = vector.load %arg1[%c7, %c0_21, %c0_22] : memref<9x64x256xf32, #tpu.memory_space<vmem>>, vector<1x64x256xf32>
    %42 = vector.shape_cast %41 : vector<1x64x256xf32> to vector<64x256xf32>
    %43 = arith.mulf %40, %42 : vector<64x256xf32>
    %44 = arith.addf %39, %43 : vector<64x256xf32>
    %c239_i32 = arith.constant 239 : i32
    %45 = tpu.dynamic_rotate %4 by %c239_i32 dim 1 : vector<64x256xf32>, i32 -> vector<64x256xf32>
    %c8 = arith.constant 8 : index
    %c0_23 = arith.constant 0 : index
    %c0_24 = arith.constant 0 : index
    %46 = vector.load %arg1[%c8, %c0_23, %c0_24] : memref<9x64x256xf32, #tpu.memory_space<vmem>>, vector<1x64x256xf32>
    %47 = vector.shape_cast %46 : vector<1x64x256xf32> to vector<64x256xf32>
    %48 = arith.mulf %45, %47 : vector<64x256xf32>
    %49 = arith.addf %44, %48 : vector<64x256xf32>
    %c0_25 = arith.constant 0 : index
    %c0_26 = arith.constant 0 : index
    %50 = vector.load %arg3[%c0_25, %c0_26] : memref<8x64xf32, #tpu.memory_space<vmem>>, vector<8x64xf32>
    %cst_27 = arith.constant dense<0.000000e+00> : vector<8x256xf32>
    %51 = tpu.matmul %50, %49, %cst_27 {dimension_numbers = #tpu.dot_dimension_numbers<[1], [0], [0], [1], [0, 0, 1, 1], [], []>} : vector<8x64xf32>, vector<64x256xf32>, vector<8x256xf32> -> vector<8x256xf32>
    %c0_28 = arith.constant 0 : index
    %52 = memref.load %arg4[%c0_28] : memref<1xf32, #tpu.memory_space<smem>>
    %53 = vector.broadcast %52 : f32 to vector<8x256xf32>
    %54 = arith.addf %51, %53 : vector<8x256xf32>
    %55 = arith.negf %54 : vector<8x256xf32>
    %56 = math.exp %55 : vector<8x256xf32>
    %cst_29 = arith.constant 1.000000e+00 : f32
    %57 = vector.broadcast %cst_29 : f32 to vector<8x256xf32>
    %58 = arith.addf %57, %56 : vector<8x256xf32>
    %59 = arith.divf %57, %58 : vector<8x256xf32>
    %c0_30 = arith.constant 0 : index
    %c0_31 = arith.constant 0 : index
    %60 = vector.load %arg7[%c0_30, %c0_31] : memref<8x256xf32, #tpu.memory_space<vmem>>, vector<8x256xf32>
    tpu.vector_store %arg7[%c0_30, %c0_31], %59 {strides = array<i32>} : memref<8x256xf32, #tpu.memory_space<vmem>>, vector<8x256xf32>,
    return
  }
  func.func @transform_0(%arg0: i32) -> (i32, i32, i32) {
    %c0_i32 = arith.constant 0 : i32
    %c0_i32_0 = arith.constant 0 : i32
    %c0_i32_1 = arith.constant 0 : i32
    %c0_i32_2 = arith.constant 0 : i32
    return %c0_i32, %c0_i32_0, %c0_i32_1 : i32, i32, i32
  }
  func.func @transform_1(%arg0: i32) -> (i32, i32) {
    %c0_i32 = arith.constant 0 : i32
    %c0_i32_0 = arith.constant 0 : i32
    %c0_i32_1 = arith.constant 0 : i32
    return %c0_i32, %c0_i32_0 : i32, i32
  }
  func.func @transform_2(%arg0: i32) -> (i32, i32) {
    %c0_i32 = arith.constant 0 : i32
    %c0_i32_0 = arith.constant 0 : i32
    %c0_i32_1 = arith.constant 0 : i32
    return %c0_i32, %c0_i32_0 : i32, i32
  }
  func.func @transform_3(%arg0: i32) -> i32 {
    %c0_i32 = arith.constant 0 : i32
    %c0_i32_0 = arith.constant 0 : i32
    return %c0_i32 : i32
  }
  func.func @transform_4(%arg0: i32) -> (i32, i32) {
    %c0_i32 = arith.constant 0 : i32
    %c0_i32_0 = arith.constant 0 : i32
    return %arg0, %c0_i32 : i32, i32
  }
  func.func @transform_5(%arg0: i32) -> (i32, i32) {
    %c0_i32 = arith.constant 0 : i32
    %c0_i32_0 = arith.constant 0 : i32
    return %arg0, %c0_i32 : i32, i32
  }
  func.func @transform_6(%arg0: i32) -> (i32, i32) {
    %c0_i32 = arith.constant 0 : i32
    %c0_i32_0 = arith.constant 0 : i32
    return %arg0, %c0_i32 : i32, i32
  }
}

</mosaic_0001>

<bundles_post_ra>
// kernel: tpu_custom_call.1
= control target key start
LH: loop header
LB: loop body
LE: loop exit
PB: predicated region body
PF: predicated region fallthrough
CT: control target
= control target key end

     0   :  { %s3042_s0 = inlined_call_operand.hbm [shape: f32[9,64,256], index: 0, kind: input, shape index: {}]   ;;  %s3043_s1 = inlined_call_operand.hbm [shape: f32[64,256], index: 1, kind: input, shape index: {}]   ;;  %s3044_s2 = inlined_call_operand.vmem [shape: f32[8,64], index: 2, kind: input, shape index: {}]   ;;  %s3045_s3 = inlined_call_operand.<no memory space> [shape: f32[1], index: 3, kind: input, shape index: {}]   ;;  %s3046_s4 = inlined_call_operand.hbm [shape: f32[64,256], index: 4, kind: input, shape index: {}]   ;;  %s3047_s5 = inlined_call_operand.hbm [shape: f32[64,64], index: 5, kind: input, shape index: {}]   ;;  %s3048_s6 = inlined_call_operand.hbm [shape: f32[16,256], index: 6, kind: output, shape index: {}]  }
   0x1   :  { %3071 = sst [smem:[#allocation26_spill]] %s3042_s0 }
   0x2   :  { %3072 = sst [smem:[#allocation27_spill]] %s3046_s4 }
   0x3   :  { %11 = sst [smem:[#allocation2]] %s3045_s3 }
   0x4   :  { %12 = vsyncpa [#allocation4], 0 }
   0x5   :  { %13 = vsyncpa [#allocation7], 0 }
   0x6   :  { %14 = vsyncpa [#allocation5], 0 }
   0x7   :  { %16 = vsyncpa [#allocation5 + $0x1], 0  ;;  %s1924_s23 = smov 0   ;;  %s1926_s24 = smov 0  }
   0x8   :  { %s1928_s25 = smov 0   ;;  %s1930_s26 = smov 0  }
   0x9 LB: > { %s1945_s3 = sadd.s32 4294967295, %s1866_s26   ;;  %s1517_s27 = sadd.s32 4294967294, %s1866_s26   ;;  %s1866_s26 = sphi %s1930_s26, %s3120_s26   ;;  %s1862_s25 = sphi %s1928_s25, %s3124_s25   ;;  %s1858_s24 = sphi %s1926_s24, %s3123_s24   ;;  %s1854_s23 = sphi %s1924_s23, %s3122_s23  }
   0xa   : > { %s1949_s28 = sadd.s32 1, %s1866_s26   ;;  %s113_s29 = sadd.s32 1, %s1862_s25 }
   0xb   : > { %3073 = sst [smem:[#allocation15_spill]] %s1949_s28  ;;  %s110_s30 = ssub.s32 %s1866_s26, %s1949_s28 }
   0xc   : > { %p120_p0 = scmp.ne.s32.totalorder %s1862_s25, %s1858_s24  ;;  %p111_p1 = scmp.eq.s32.totalorder %s110_s30, 0 }
   0xd   : > { %p121_p2 = scmp.eq.s32.totalorder %s1866_s26, 0  ;;  %p126_p3 = scmp.ne.s32.totalorder %s1858_s24, %s1854_s23 }
   0xe   : > { %p3049_p4 = scmp.eq.s32.totalorder %s1945_s3, 0  ;;  %p176_p7 = scmp.eq.s32.totalorder %s1945_s3, 1 }
   0xf   : > { %s1961_s7 = scalar_select %p111_p1, %s1862_s25, %s113_s29  }
  0x10   : > { %p1963_p5 = por %p121_p2, %p120_p0  ;;  %p1969_p6 = por %p3049_p4, %p126_p3 }
  0x11   : > { %3074 = sst [smem:[#allocation16_spill]] %s1961_s7  ;;  %p182_p8 = scmp.eq.s32.totalorder %s1517_s27, 1 }
  0x12   : > { %s3075_s8 = scalar_select %p1963_p5, 1, 0 }
  0x13   : > { %s3076_s9 = scalar_select %p1969_p6, 1, 0 }
  0x14   : > { %p1518_p9 = scmp.ge.s32.totalorder %s1866_s26, 1  ;;  %p189_p10 = scmp.lt.s32.totalorder %s1866_s26, 3 }
  0x15   : > { %p1976_p11 = por %p176_p7, %p120_p0  ;;  %p1980_p12 = por %p182_p8, %p126_p3 }
  0x16   : > { %p1984_p13 = pnand %p1518_p9, %p189_p10  ;;  %s1868_s13 = smov [#allocation3]  }
  0x17   : > { %s3077_s10 = scalar_select %p1976_p11, 1, 0 }
  0x18   : > { %s3078_s11 = scalar_select %p1980_p12, 1, 0 }
  0x19   : > { %s3079_s12 = scalar_select %p1984_p13, 1, 0 }
  0x1a   : > { %p1597_p1 = pneg %p1984_p13  ;;  %s201_s14 = sshll.u32 %s1868_s13, 4  ;;  %s202_s14 = int_to_ptr.vmem [resolvable:$true] %s201_s14 }
  0x1b   : > { %s234_s16 = sand.u32 1, %s1866_s26   ;;  %s3081_s0 = sld [smem:[#allocation26_spill]] }
  0x1c   : > { %p1992_p2 = pnand %p1597_p1, %p3049_p4 }
  0x1e   : > { %p3056_p8 = pneg %p1992_p2 }
  0x21   : > { %s1676_s19 = scalar_lea.hbm %s3081_s0, 18432 }
  0x22   : > { %p1677_p7 = scmp.ne.s32.totalorder %s3081_s0, %s1676_s19  ;;  %p1683_p1 = scmp.lt.u32.totalorder %s1676_s19, %s3081_s0 }
  0x24   : > { %p1679_p9 = pnand %p3056_p8, %p1677_p7 }
  0x26   : > { %p1680_p10 = pneg %p1679_p9 }
  0x28   : > { %p1685_p0 = pnand %p1683_p1, %p1680_p10 }
  0x2a   : > { %1688 = shalt.err (!%p1685_p0)
}
  0x2b   : > { %s1689_s29 = scalar_lea.vmem %s202_s14, 18432  ;;  %p1697_p11 = scmp.lt.s32.totalorder %s202_s14, %s202_s14 }
  0x2c   : > { %p1690_p4 = scmp.ne.s32.totalorder %s202_s14, %s1689_s29  ;;  %p1698_p6 = scmp.lt.s32.totalorder %s1689_s29, %s1689_s29 }
  0x2e   : > { %p1692_p3 = pnand %p1690_p4, %p3056_p8  ;;  %p1699_p13 = por %p1698_p6, %p1697_p11 }
  0x30   : > { %p1693_p12 = pneg %p1692_p3 }
  0x32   : > { %p1700_p5 = pnand %p1699_p13, %p1693_p12 }
  0x34   : > { %1703 = shalt.err (!%p1700_p5)
}
  0x35   : > { %s3054_s30 = smov 256   ;;  %s1870_s13 = smov 16  }
  0x36   : > { %1600 = dma.hbm_to_vmem [thread:$0]  (!%p1992_p2), %s3081_s0, 18432, %s202_s14, [#allocation4], %s3054_s30, %s3054_s30, %s1870_s13  }
  0x37   : > { %p3082_p4 = scmp.ne.s32.totalorder %s3075_s8, 0  ;;  %p3083_p6 = scmp.lt.s32.totalorder %s1866_s26, 2 }
  0x38   : > { %s3053_s20 = sand.u32 1, %s1862_s25   ;;  %s1548_s22 = sshll.u32 %s1866_s26, 10 }
  0x39   : > { %p2028_p11 = pnand %p3083_p6, %p3082_p4  ;;  %s1522_s21 = sshll.u32 %s3053_s20, 6 }
  0x3a   : > { %s3085_s4 = sld [smem:[#allocation27_spill]]  ;;  %s238_s8 = scalar_lea.vmem [#allocation8], %s1522_s21 }
  0x3b   : > { %s3084_s19 = scalar_select %p2028_p11, 1, 0 }
  0x3c   : > { %s246_s14 = sshll.u32 %s238_s8, 4  ;;  %s2043_s17 = scalar_lea.sflag [#allocation4], %s234_s16  ;;  %s2041_s14 = int_to_ptr.vmem [resolvable:$true] %s246_s14 }
  0x3d   : > { %p3059_p12 = pneg %p2028_p11 }
  0x40   : > { %s2039_s7 = scalar_lea.hbm %s3085_s4, %s1548_s22  ;;  %s1709_s29 = scalar_lea.hbm %s3085_s4, 2048 }
  0x41   : > { %s1704_s18 = scalar_lea.hbm %s2039_s7, 1024  ;;  %p1710_p3 = scmp.lt.u32.totalorder %s2039_s7, %s3085_s4 }
  0x42   : > { %p1705_p5 = scmp.ne.s32.totalorder %s2039_s7, %s1704_s18  ;;  %p1711_p7 = scmp.lt.u32.totalorder %s1709_s29, %s1704_s18 }
  0x43   : > { %p1713_p10 = scmp.lt.u32.totalorder %s1704_s18, %s2039_s7 }
  0x44   : > { %p1707_p13 = pnand %p3059_p12, %p1705_p5  ;;  %p1712_p9 = por %p1711_p7, %p1710_p3 }
  0x46   : > { %p1708_p0 = pneg %p1707_p13  ;;  %p1714_p1 = por %p1713_p10, %p1712_p9 }
  0x48   : > { %p1715_p4 = pnand %p1714_p1, %p1708_p0 }
  0x4a   : > { %1718 = shalt.err (!%p1715_p4)
}
  0x4b   : > { %s1719_s16 = scalar_lea.vmem %s2041_s14, 1024  ;;  %s1871_s21 = smov [#allocation8]  }
  0x4c   : > { %p1720_p6 = scmp.ne.s32.totalorder %s2041_s14, %s1719_s16  ;;  %s1724_s8 = sshll.u32 %s1871_s21, 4  ;;  %s1725_s8 = int_to_ptr.vmem [resolvable:$false] %s1724_s8 }
  0x4d   : > { %s1726_s30 = scalar_lea.vmem %s1725_s8, 2048  ;;  %p1727_p8 = scmp.lt.s32.totalorder %s2041_s14, %s1725_s8 }
  0x4e   : > { %p1722_p5 = pnand %p1720_p6, %p3059_p12  ;;  %p1728_p3 = scmp.lt.s32.totalorder %s1726_s30, %s1719_s16 }
  0x50   : > { %p1723_p13 = pneg %p1722_p5  ;;  %p1729_p7 = por %p1728_p3, %p1727_p8 }
  0x52   : > { %p1730_p9 = pnand %p1729_p7, %p1723_p13 }
  0x54   : > { %1733 = shalt.err (!%p1730_p9)
}
  0x55   : > { %s3086_s20 = smov 256   ;;  %s1872_s18 = smov [#allocation6]  }
  0x56   : > { %1607 = dma.hbm_to_vmem [thread:$0]  (!%p2028_p11), %s2039_s7, 1024, %s2041_s14, %s2043_s17, %s3086_s20, %s3086_s20, %s1870_s13  }
  0x57   : > { %s214_s22 = sshll.u32 %s1872_s18, 4  ;;  %s3087_s27 = sand.u32 1, %s1862_s25   ;;  %s215_s22 = int_to_ptr.vmem [resolvable:$true] %s214_s22 }
  0x58   : > { %s1526_s29 = sshll.u32 %s3087_s27, 5  ;;  %s1734_s8 = scalar_lea.hbm %s3043_s1, 2048 }
  0x59   : > { %p1735_p8 = scmp.ne.s32.totalorder %s3043_s1, %s1734_s8  ;;  %p3088_p0 = pneg %p1992_p2 }
  0x5a   : > { %p1741_p4 = scmp.lt.u32.totalorder %s1734_s8, %s3043_s1 }
  0x5b   : > { %p1737_p10 = pnand %p1735_p8, %p3088_p0 }
  0x5d   : > { %p1738_p1 = pneg %p1737_p10 }
  0x5f   : > { %p1743_p6 = pnand %p1741_p4, %p1738_p1 }
  0x61   : > { %1746 = shalt.err (!%p1743_p6)
}
  0x62   : > { %s1747_s7 = scalar_lea.vmem %s215_s22, 2048  ;;  %p3089_p13 = pmov %p3088_p0 }
  0x63   : > { %p1748_p5 = scmp.ne.s32.totalorder %s215_s22, %s1747_s7  ;;  %p1755_p9 = scmp.lt.s32.totalorder %s215_s22, %s215_s22 }
  0x64   : > { %p1756_p12 = scmp.lt.s32.totalorder %s1747_s7, %s1747_s7 }
  0x65   : > { %p1750_p3 = pnand %p1748_p5, %p3089_p13 }
  0x66   : > { %p1757_p11 = por %p1756_p12, %p1755_p9 }
  0x67   : > { %p1751_p7 = pneg %p1750_p3 }
  0x69   : > { %p1758_p0 = pnand %p1757_p11, %p1751_p7 }
  0x6b   : > { %1761 = shalt.err (!%p1758_p0)
}
  0x6c   : > { %1603 = dma.hbm_to_vmem [thread:$0]  (!%p1992_p2), %s3043_s1, 2048, %s215_s22, [#allocation7], %s3086_s20, %s3086_s20, %s1870_s13  }
  0x6d   : > { %s1549_s28 = sshll.u32 %s1866_s26, 9  ;;  %s260_s14 = scalar_lea.vmem [#allocation9], %s1526_s29 }
  0x6e   : > { %s267_s18 = sshll.u32 %s260_s14, 4  ;;  %s2103_s21 = scalar_lea.hbm %s3047_s5, %s1549_s28  ;;  %s2105_s18 = int_to_ptr.vmem [resolvable:$true] %s267_s18 }
  0x6f   : > { %s1762_s15 = scalar_lea.hbm %s2103_s21, 512  ;;  %p3090_p12 = scmp.ne.s32.totalorder %s3084_s19, 0 }
  0x70   : > { %p1763_p11 = scmp.ne.s32.totalorder %s2103_s21, %s1762_s15  ;;  %s1767_s22 = scalar_lea.hbm %s3047_s5, 1024 }
  0x71   : > { %p3091_p8 = pneg %p3090_p12  ;;  %p1768_p1 = scmp.lt.u32.totalorder %s2103_s21, %s3047_s5 }
  0x72   : > { %p1769_p4 = scmp.lt.u32.totalorder %s1767_s22, %s1762_s15  ;;  %p1771_p5 = scmp.lt.u32.totalorder %s1762_s15, %s2103_s21 }
  0x73   : > { %p1765_p10 = pnand %p1763_p11, %p3091_p8 }
  0x74   : > { %p1770_p6 = por %p1769_p4, %p1768_p1 }
  0x75   : > { %p1766_p2 = pneg %p1765_p10 }
  0x76   : > { %p1772_p13 = por %p1771_p5, %p1770_p6 }
  0x78   : > { %p1773_p3 = pnand %p1772_p13, %p1766_p2 }
  0x7a   : > { %1776 = shalt.err (!%p1773_p3)
}
  0x7b   : > { %s1777_s30 = scalar_lea.vmem %s2105_s18, 512  ;;  %p3092_p9 = pmov %p3091_p8 }
  0x7c   : > { %p1778_p7 = scmp.ne.s32.totalorder %s2105_s18, %s1777_s30  ;;  %s1873_s7 = smov [#allocation9]  }
  0x7d   : > { %s1782_s0 = sshll.u32 %s1873_s7, 4  ;;  %s1783_s0 = int_to_ptr.vmem [resolvable:$false] %s1782_s0 }
  0x7e   : > { %p1780_p0 = pnand %p1778_p7, %p3092_p9  ;;  %s1784_s4 = scalar_lea.vmem %s1783_s0, 1024 }
  0x7f   : > { %p1785_p8 = scmp.lt.s32.totalorder %s2105_s18, %s1783_s0  ;;  %p1786_p10 = scmp.lt.s32.totalorder %s1784_s4, %s1777_s30 }
  0x80   : > { %p1781_p11 = pneg %p1780_p0 }
  0x81   : > { %p1787_p1 = por %p1786_p10, %p1785_p8 }
  0x83   : > { %p1788_p4 = pnand %p1787_p1, %p1781_p11 }
  0x85   : > { %1791 = shalt.err (!%p1788_p4)
}
  0x86   : > { %s1874_s28 = smov 128   ;;  %s1875_s14 = smov 8  }
  0x87   : > { %1610 = dma.hbm_to_vmem [thread:$0]  (!%p3090_p12), %s2103_s21, 512, %s2105_s18, %s2043_s17, %s1874_s28, %s1874_s28, %s1875_s14  }
  0x88   : > { %p3093_p2 = scmp.ne.s32.totalorder %s3079_s12, 0 }
  0x8a   : > { %279 = sbr.rel (%p3093_p2) target bundleno = 897 (0x381), region = 44 }
  0x91   : > { %p3094_p6 = scmp.eq.s32.totalorder %s1945_s3, 0 }
  0x93   : > { %1837 = dma.done.wait (%p3094_p6), [#allocation4], 18432   ;;  %p3095_p5 = pmov %p3094_p6 }
  0x95   : > { %1839 = vsyncadd (%p3095_p5), [#allocation4], 4294948864  ;;  %p3096_p13 = pmov %p3095_p5 }
  0x96   : > { %p3097_p3 = pmov %p3095_p5 }
  0x97   : > { %1841 = dma.done.wait (%p3096_p13), [#allocation7], 2048  }
  0x98   : > { %1843 = vsyncadd (%p3097_p3), [#allocation7], 4294965248  ;;  %s289_s19 = sand.u32 1, %s1945_s3   ;;  %s2143_s17 = sand.u32 1, %s1858_s24  }
  0x99   : > { %s1532_s12 = sshll.u32 %s2143_s17, 6  ;;  %s290_s18 = scalar_lea.sflag [#allocation4], %s289_s19 }
  0x9a   : > { %s2146_s27 = scalar_lea.vmem [#allocation8], %s1532_s12  ;;  %p3098_p12 = scmp.ne.s32.totalorder %s3076_s9, 0 }
  0x9c   : > { %1845 = dma.done.wait (%p3098_p12), %s290_s18, 1536  }
  0x9d   : > { %1847 = vsyncadd (%p3098_p12), %s290_s18, 4294965760  ;;  %v1876_v0 = vmov 0.0   ;;  %v351_v1 = vld [vmem:[#allocation6 + $0x8] sm:$0xff]  ;;  %v353_v2 = vld [vmem:[#allocation6 + $0x18] sm:$0xff]  ;;  %s1877_s9 = smov 17   ;;  %s1533_s16 = sshll.u32 %s2143_s17, 5 }
  0x9e   : > { %443 = vmatprep.mubr.f32.mxu0 %v1876_v0  ;;  %1372 = vmatprep.mubr.f32.mxu1 %v1876_v0  ;;  %v350_v3 = vld [vmem:[#allocation6] sm:$0xff]  ;;  %v1551_v4 = vpack.c.bf16 %v353_v2, %v351_v1  ;;  %v352_v5 = vld [vmem:[#allocation6 + $0x10] sm:$0xff]  ;;  %v355_v6 = vld [vmem:[#allocation6 + $0x28] sm:$0xff]  ;;  %s1878_s21 = smov 16   ;;  %s302_s15 = scalar_lea.vmem [#allocation9], %s1533_s16  ;;  %vm366_vm0 = vcmask 523264  }
  0x9f   : > { %v357_v7 = vld [vmem:[#allocation6 + $0x38] sm:$0xff]  ;;  %v1553_v8 = vpack.c.bf16 %v352_v5, %v350_v3  ;;  %v354_v10 = vld [vmem:[#allocation6 + $0x20] sm:$0xff]  ;;  %v356_v11 = vld [vmem:[#allocation6 + $0x30] sm:$0xff]  ;;  %s1879_s13 = smov 15   ;;  %s1880_s20 = smov 1   ;;  %v500_v3 = vlaneseq }
  0xa0   : > { %v1555_v9 = vpack.c.bf16 %v357_v7, %v355_v6  ;;  %v359_v12 = vld [vmem:[#allocation6 + $0x48] sm:$0xff]  ;;  %1552 = vmatprep.subr.bf16.mxu0 %v1551_v4  ;;  %v361_v13 = vld [vmem:[#allocation6 + $0x58] sm:$0xff]  ;;  %v1557_v14 = vpack.c.bf16 %v356_v11, %v354_v10  ;;  %v2158_v16 = vld [vmem:[%s2146_s27] sm:$0xff]  ;;  %s1881_s22 = smov 127   ;;  %s1882_s29 = smov 113  }
  0xa1   : > { %1554 = vmatpush1.bf16.msra.mxu0 %v1553_v8  ;;  %v2155_v15 = vld [vmem:[%s2146_s27 + $0x8] sm:$0xff]  ;;  %v1559_v17 = vpack.c.bf16 %v361_v13, %v359_v12  ;;  %v358_v18 = vld [vmem:[#allocation6 + $0x40] sm:$0xff]  ;;  %v360_v19 = vld [vmem:[#allocation6 + $0x50] sm:$0xff]  ;;  %468 = vrot.lane.b32.xlu0 %v2158_v16, %s1877_s9  ;;  %s1883_s8 = smov 112   ;;  %s1884_s30 = smov 111   ;;  %v2358_v6 = vand.u32 127, %v500_v3 }
  0xa2   : > { %1556 = vmatprep.subr.bf16.mxu0 %v1555_v9  ;;  %484 = vrot.lane.b32.xlu1 %v2155_v15, %s1877_s9  ;;  %v363_v20 = vld [vmem:[#allocation6 + $0x68] sm:$0xff]  ;;  %v365_v21 = vld [vmem:[#allocation6 + $0x78] sm:$0xff]  ;;  %v2168_v23 = vld [vmem:[%s2146_s27 + $0x10] sm:$0xff]  ;;  %v1561_v24 = vpack.c.bf16 %v360_v19, %v358_v18  ;;  %s1303_s4 = sld [smem:[#allocation2]]  ;;  %s1534_s28 = sshll.u32 %s2143_s17, 4 }
  0xa3   : > { %v2165_v22 = vld [vmem:[%s2146_s27 + $0x18] sm:$0xff]  ;;  %v1563_v25 = vpack.c.bf16 %v365_v21, %v363_v20  ;;  %v362_v26 = vld [vmem:[#allocation6 + $0x60] sm:$0xff]  ;;  %v364_v27 = vld [vmem:[#allocation6 + $0x70] sm:$0xff]  ;;  %vm502_vm1 = vcmp.lt.s32.totalorder %v2358_v6, 17  ;;  %vm599_vm2 = vcmp.lt.s32.totalorder %v2358_v6, 16  ;;  %vm697_vm3 = vcmp.lt.s32.totalorder %v2358_v6, 15 }
  0xa4   : > { %v1565_v28 = vpack.c.bf16 %v364_v27, %v362_v26  ;;  %v346_v29 = vld [vmem:[%s302_s15] sm:$0xff]  ;;  %v347_v30 = vld [vmem:[%s302_s15 + $0x8] sm:$0xff]  ;;  %v348_v31 = vld [vmem:[%s302_s15 + $0x10] sm:$0xff]  ;;  %vm795_vm4 = vcmp.lt.s32.totalorder %v2358_v6, 1  ;;  %vm942_vm5 = vcmp.lt.s32.totalorder %v2358_v6, 127  ;;  %vm1040_vm6 = vcmp.lt.s32.totalorder %v2358_v6, 113 }
  0xa5   : > { %1558 = vmatpush1.bf16.msra.mxu0 %v1557_v14  ;;  %470 = vrot.lane.b32.xlu0 %v2168_v23, %s1877_s9  ;;  %v2196_v32 = vld [vmem:[%s2146_s27 + $0x30] sm:$0xff]  ;;  %v2199_v33 = vld [vmem:[%s2146_s27 + $0x20] sm:$0xff]  ;;  %v349_v34 = vld [vmem:[%s302_s15 + $0x18] sm:$0xff]  ;;  %vm1138_vm7 = vcmp.lt.s32.totalorder %v2358_v6, 112  ;;  %vm1236_vm8 = vcmp.lt.s32.totalorder %v2358_v6, 111  ;;  %s1550_s14 = sshll.u32 %s1945_s3, 8 }
  0xa6   : > { %1560 = vmatprep.subr.bf16.mxu0 %v1559_v17  ;;  %486 = vrot.lane.b32.xlu1 %v2165_v22, %s1877_s9  ;;  %v2208_v35 = vld [vmem:[%s2146_s27 + $0x38] sm:$0xff]  ;;  %v2211_v36 = vld [vmem:[%s2146_s27 + $0x28] sm:$0xff]  ;;  %v521_v9 = vld [vmem:[#allocation3 + $0x10] sm:$0xff]  ;;  %s335_s19 = scalar_lea.vmem [#allocation10], %s1534_s28  ;;  %s1394_s16 = scalar_lea.sflag [#allocation5], %s2143_s17 }
  0xa7   : > { %3099 = vst [vmem:[#allocation17_spill] sm:$0xff] %v2211_v36  ;;  %v522_v11 = vld [vmem:[#allocation3 + $0x18] sm:$0xff]  ;;  %v619_v14 = vld [vmem:[#allocation3 + $0x90] sm:$0xff]  ;;  %v519_v21 = vld [vmem:[#allocation3] sm:$0xff]  ;;  %s1408_s12 = sshll.u32 %s335_s19, 4  ;;  %p3117_p9 = scmp.ne.s32.totalorder %s3077_s10, 0  ;;  %s3000_s12 = int_to_ptr.vmem [resolvable:$true] %s1408_s12 }
  0xa8   : > { %v620_v17 = vld [vmem:[#allocation3 + $0x98] sm:$0xff]  ;;  %v1304_v6 = vstv %s1303_s4  ;;  %s1885_s3 = smov [#allocation10]  }
  0xa9   : > { %1562 = vmatpush1.bf16.msra.mxu0 %v1561_v24  ;;  %567 = vrot.lane.b32.xlu0 %v2158_v16, %s1878_s21  ;;  %s1796_s15 = sshll.u32 %s1885_s3, 4  ;;  %s1797_s15 = int_to_ptr.vmem [resolvable:$false] %s1796_s15 }
  0xaa   : > { %1564 = vmatprep.subr.bf16.mxu0 %v1563_v25  ;;  %569 = vrot.lane.b32.xlu1 %v2168_v23, %s1878_s21  ;;  %v617_v25 = vld [vmem:[#allocation3 + $0x80] sm:$0xff]  ;;  %p1799_p8 = scmp.lt.s32.totalorder %s3000_s12, %s1797_s15 }
  0xad   : > { %1566 = vmatpush1.bf16.msra.mxu0 %v1565_v28  ;;  %583 = vrot.lane.b32.xlu0 %v2155_v15, %s1878_s21  ;;  %v520_v28 = vld [vmem:[#allocation3 + $0x8] sm:$0xff] }
  0xae   : > { %585 = vrot.lane.b32.xlu1 %v2165_v22, %s1878_s21 }
  0xb0   : > { %1535 = vmatmul.mubr.msk.f32.vlgmr.msra.gmra.mrb[0].mxu0 %vm366_vm0, %v346_v29 }
  0xb1   : > { %449 = vmatprep.mubr.f32.mxu0 %v1876_v0  ;;  %665 = vrot.lane.b32.xlu0 %v2158_v16, %s1879_s13 }
  0xb2   : > { %667 = vrot.lane.b32.xlu1 %v2168_v23, %s1879_s13 }
  0xb4   : > { %1536 = vmatmul.mubr.msk.f32.gmra.mrb[2].mxu0 %vm366_vm0, %v347_v30 }
  0xb5   : > { %455 = vmatprep.mubr.f32.mxu0 %v1876_v0  ;;  %681 = vrot.lane.b32.xlu0 %v2155_v15, %s1879_s13 }
  0xb6   : > { %683 = vrot.lane.b32.xlu1 %v2165_v22, %s1879_s13 }
  0xb8   : > { %1537 = vmatmul.mubr.msk.f32.gmra.mrb[4].mxu0 %vm366_vm0, %v348_v31 }
  0xb9   : > { %461 = vmatprep.mubr.f32.mxu0 %v1876_v0  ;;  %472 = vrot.lane.b32.xlu0 %v2199_v33, %s1877_s9 }
  0xba   : > { %474 = vrot.lane.b32.xlu1 %v2196_v32, %s1877_s9 }
  0xbc   : > { %1538 = vmatmul.mubr.msk.f32.gmra.mrb[6].mxu0 %vm366_vm0, %v349_v34 }
  0xbd   : > { %488 = vrot.lane.b32.xlu0 %v2211_v36, %s1877_s9 }
  0xbe   : > { %490 = vrot.lane.b32.xlu1 %v2208_v35, %s1877_s9 }
  0xc1   : > { %571 = vrot.lane.b32.xlu0 %v2199_v33, %s1878_s21 }
  0xc2   : > { %573 = vrot.lane.b32.xlu1 %v2196_v32, %s1878_s21 }
  0xc5   : > { %587 = vrot.lane.b32.xlu0 %v2211_v36, %s1878_s21 }
  0xc6   : > { %589 = vrot.lane.b32.xlu1 %v2208_v35, %s1878_s21 }
  0xc9   : > { %763 = vrot.lane.b32.xlu0 %v2158_v16, %s1880_s20 }
  0xca   : > { %765 = vrot.lane.b32.xlu1 %v2168_v23, %s1880_s20 }
  0xcd   : > { %779 = vrot.lane.b32.xlu0 %v2155_v15, %s1880_s20 }
  0xce   : > { %781 = vrot.lane.b32.xlu1 %v2165_v22, %s1880_s20 }
  0xd1   : > { %669 = vrot.lane.b32.xlu0 %v2199_v33, %s1879_s13 }
  0xd2   : > { %671 = vrot.lane.b32.xlu1 %v2196_v32, %s1879_s13 }
  0xd5   : > { %685 = vrot.lane.b32.xlu0 %v2211_v36, %s1879_s13 }
  0xd6   : > { %687 = vrot.lane.b32.xlu1 %v2208_v35, %s1879_s13 }
  0xd9   : > { %767 = vrot.lane.b32.xlu0 %v2199_v33, %s1880_s20 }
  0xda   : > { %769 = vrot.lane.b32.xlu1 %v2196_v32, %s1880_s20 }
  0xdd   : > { %783 = vrot.lane.b32.xlu0 %v2211_v36, %s1880_s20 }
  0xde   : > { %785 = vrot.lane.b32.xlu1 %v2208_v35, %s1880_s20 }
  0xe1   : > { %910 = vrot.lane.b32.xlu0 %v2158_v16, %s1881_s22 }
  0xe2   : > { %912 = vrot.lane.b32.xlu1 %v2168_v23, %s1881_s22 }
  0xe5   : > { %926 = vrot.lane.b32.xlu0 %v2155_v15, %s1881_s22 }
  0xe6   : > { %928 = vrot.lane.b32.xlu1 %v2165_v22, %s1881_s22 }
  0xe9   : > { %1008 = vrot.lane.b32.xlu0 %v2158_v16, %s1882_s29 }
  0xea   : > { %1010 = vrot.lane.b32.xlu1 %v2168_v23, %s1882_s29 }
  0xed   : > { %1024 = vrot.lane.b32.xlu0 %v2155_v15, %s1882_s29 }
  0xee   : > { %1026 = vrot.lane.b32.xlu1 %v2165_v22, %s1882_s29 }
  0xf1   : > { %914 = vrot.lane.b32.xlu0 %v2199_v33, %s1881_s22 }
  0xf2   : > { %916 = vrot.lane.b32.xlu1 %v2196_v32, %s1881_s22 }
  0xf5   : > { %930 = vrot.lane.b32.xlu0 %v2211_v36, %s1881_s22 }
  0xf6   : > { %932 = vrot.lane.b32.xlu1 %v2208_v35, %s1881_s22 }
  0xf9   : > { %1106 = vrot.lane.b32.xlu0 %v2158_v16, %s1883_s8 }
  0xfa   : > { %1108 = vrot.lane.b32.xlu1 %v2168_v23, %s1883_s8 }
  0xfd   : > { %1122 = vrot.lane.b32.xlu0 %v2155_v15, %s1883_s8 }
  0xfe   : > { %1124 = vrot.lane.b32.xlu1 %v2165_v22, %s1883_s8 }
 0x101   : > { %1012 = vrot.lane.b32.xlu0 %v2199_v33, %s1882_s29 }
 0x102   : > { %1014 = vrot.lane.b32.xlu1 %v2196_v32, %s1882_s29 }
 0x105   : > { %1028 = vrot.lane.b32.xlu0 %v2211_v36, %s1882_s29 }
 0x106   : > { %1030 = vrot.lane.b32.xlu1 %v2208_v35, %s1882_s29 }
 0x109   : > { %1204 = vrot.lane.b32.xlu0 %v2158_v16, %s1884_s30 }
 0x10a   : > { %1206 = vrot.lane.b32.xlu1 %v2168_v23, %s1884_s30 }
 0x10d   : > { %1220 = vrot.lane.b32.xlu0 %v2155_v15, %s1884_s30 }
 0x10e   : > { %1222 = vrot.lane.b32.xlu1 %v2165_v22, %s1884_s30 }
 0x111   : > { %1110 = vrot.lane.b32.xlu0 %v2199_v33, %s1883_s8 }
 0x112   : > { %1112 = vrot.lane.b32.xlu1 %v2196_v32, %s1883_s8 }
 0x113   : > { %v469_v38 = vpop.permute.xlu0 %468 }
 0x114   : > { %v485_v37 = vpop.permute.xlu1 %484 }
 0x115   : > { %1126 = vrot.lane.b32.xlu0 %v2211_v36, %s1883_s8  ;;  %v511_v24 = vsel %vm502_vm1, %v485_v37, %v469_v38  ;;  %v503_v27 = vsel %vm502_vm1, %v469_v38, %v485_v37  ;;  %v718_v37 = vld [vmem:[#allocation3 + $0x118] sm:$0xff] }
 0x116   : > { %1128 = vrot.lane.b32.xlu1 %v2208_v35, %s1883_s8 }
 0x117   : > { %v471_v40 = vpop.permute.xlu0 %470 }
 0x118   : > { %v487_v39 = vpop.permute.xlu1 %486 }
 0x119   : > { %1208 = vrot.lane.b32.xlu0 %v2199_v33, %s1884_s30  ;;  %v504_v12 = vsel %vm502_vm1, %v471_v40, %v487_v39  ;;  %v512_v13 = vsel %vm502_vm1, %v487_v39, %v471_v40  ;;  %v535_v40 = vmul.f32 %v519_v21, %v511_v24  ;;  %v863_v21 = vld [vmem:[#allocation3 + $0x208] sm:$0xff] }
 0x11a   : > { %1210 = vrot.lane.b32.xlu1 %v2196_v32, %s1884_s30  ;;  %v537_v29 = vmul.f32 %v521_v9, %v512_v13  ;;  %v538_v30 = vmul.f32 %v522_v11, %v504_v12  ;;  %v715_v9 = vld [vmem:[#allocation3 + $0x100] sm:$0xff]  ;;  %v536_v12 = vmul.f32 %v520_v28, %v503_v27 }
 0x11b   : > { %v568_v42 = vpop.permute.xlu0 %567 }
 0x11c   : > { %v570_v41 = vpop.permute.xlu1 %569 }
 0x11d   : > { %1224 = vrot.lane.b32.xlu0 %v2211_v36, %s1884_s30  ;;  %v717_v36 = vld [vmem:[#allocation3 + $0x110] sm:$0xff] }
 0x11e   : > { %1226 = vrot.lane.b32.xlu1 %v2208_v35, %s1884_s30 }
 0x11f   : > { %v584_v44 = vpop.permute.xlu0 %583 }
 0x120   : > { %v586_v43 = vpop.permute.xlu1 %585  ;;  %v608_v26 = vsel %vm599_vm2, %v584_v44, %v568_v42 }
 0x121   : > { %v601_v18 = vsel %vm599_vm2, %v570_v41, %v586_v43  ;;  %v609_v19 = vsel %vm599_vm2, %v586_v43, %v570_v41  ;;  %v618_v41 = vld [vmem:[#allocation3 + $0x88] sm:$0xff]  ;;  %v600_v43 = vsel %vm599_vm2, %v568_v42, %v584_v44  ;;  %v633_v3 = vmul.f32 %v617_v25, %v608_v26  ;;  %v864_v42 = vld [vmem:[#allocation3 + $0x210] sm:$0xff] }
 0x122   : > { %v635_v31 = vmul.f32 %v619_v14, %v609_v19  ;;  %v636_v34 = vmul.f32 %v620_v17, %v601_v18  ;;  %v634_v14 = vmul.f32 %v618_v41, %v600_v43  ;;  %v865_v18 = vld [vmem:[#allocation3 + $0x218] sm:$0xff]  ;;  %v862_v19 = vld [vmem:[#allocation3 + $0x200] sm:$0xff]  ;;  %v716_v25 = vld [vmem:[#allocation3 + $0x108] sm:$0xff] }
 0x123   : > { %v2314_v46 = vpop.permute.xlu0 %665  ;;  %v815_v41 = vld [vmem:[#allocation3 + $0x190] sm:$0xff] }
 0x124   : > { %v668_v45 = vpop.permute.xlu1 %667  ;;  %v651_v44 = vadd.f32 %v635_v31, %v537_v29  ;;  %v652_v13 = vadd.f32 %v636_v34, %v538_v30  ;;  %v2409_v29 = vmul.f32 %v864_v42, %v2168_v23  ;;  %v2418_v30 = vmul.f32 %v862_v19, %v2158_v16  ;;  %v525_v43 = vld [vmem:[#allocation3 + $0x30] sm:$0xff]  ;;  %v816_v16 = vld [vmem:[#allocation3 + $0x198] sm:$0xff]  ;;  %v621_v19 = vld [vmem:[#allocation3 + $0xa0] sm:$0xff] }
 0x125   : > { %v650_v31 = vadd.f32 %v634_v14, %v536_v12  ;;  %v524_v12 = vld [vmem:[#allocation3 + $0x28] sm:$0xff]  ;;  %v813_v14 = vld [vmem:[#allocation3 + $0x180] sm:$0xff] }
 0x127   : > { %v2316_v48 = vpop.permute.xlu0 %681 }
 0x128   : > { %v684_v47 = vpop.permute.xlu1 %683  ;;  %v706_v11 = vsel %vm697_vm3, %v2316_v48, %v2314_v46  ;;  %v698_v26 = vsel %vm697_vm3, %v2314_v46, %v2316_v48 }
 0x129   : > { %v699_v38 = vsel %vm697_vm3, %v668_v45, %v684_v47  ;;  %v731_v27 = vmul.f32 %v715_v9, %v706_v11  ;;  %v523_v11 = vld [vmem:[#allocation3 + $0x20] sm:$0xff] }
 0x12b   : > { %v2320_v50 = vpop.permute.xlu0 %472 }
 0x12c   : > { %v2318_v49 = vpop.permute.xlu1 %474 }
 0x12f   : > { %v2324_v52 = vpop.permute.xlu0 %488 }
 0x130   : > { %v2322_v51 = vpop.permute.xlu1 %490  ;;  %v505_v42 = vsel %vm502_vm1, %v2320_v50, %v2324_v52 }
 0x131   : > { %v514_v9 = vsel %vm502_vm1, %v2322_v51, %v2318_v49 }
 0x133   : > { %v2328_v54 = vpop.permute.xlu0 %571 }
 0x134   : > { %v2326_v53 = vpop.permute.xlu1 %573 }
 0x137   : > { %v2332_v56 = vpop.permute.xlu0 %587 }
 0x138   : > { %v2330_v55 = vpop.permute.xlu1 %589 }
 0x13b   : > { %v2336_v58 = vpop.permute.xlu0 %763 }
 0x13c   : > { %v2334_v57 = vpop.permute.xlu1 %765 }
 0x13f   : > { %v2340_v60 = vpop.permute.xlu0 %779 }
 0x140   : > { %v2338_v59 = vpop.permute.xlu1 %781 }
 0x141   : > { %v805_v46 = vsel %vm795_vm4, %v2338_v59, %v2334_v57 }
 0x143   : > { %v2344_v62 = vpop.permute.xlu0 %669 }
 0x144   : > { %v2342_v61 = vpop.permute.xlu1 %671 }
 0x147   : > { %v2348_v0 = vpop.permute.xlu0 %685 }
 0x148   : > { %v2346_v63 = vpop.permute.xlu1 %687 }
 0x14b   : > { %v2352_v2 = vpop.permute.xlu0 %767 }
 0x14c   : > { %v2350_v1 = vpop.permute.xlu1 %769  ;;  %3100 = vst [vmem:[#allocation18_spill] sm:$0xff] %v2352_v2  ;;  %v707_v2 = vsel %vm697_vm3, %v684_v47, %v668_v45  ;;  %v649_v45 = vadd.f32 %v633_v3, %v535_v40  ;;  %v734_v47 = vmul.f32 %v718_v37, %v699_v38  ;;  %v732_v40 = vmul.f32 %v716_v25, %v698_v26  ;;  %v526_v3 = vld [vmem:[#allocation3 + $0x38] sm:$0xff] }
 0x14d   : > { %v733_v17 = vmul.f32 %v717_v36, %v707_v2  ;;  %v2412_v36 = vmul.f32 %v865_v18, %v2165_v22  ;;  %v2415_v2 = vmul.f32 %v863_v21, %v2155_v15  ;;  %v506_v15 = vsel %vm502_vm1, %v2318_v49, %v2322_v51  ;;  %v622_v21 = vld [vmem:[#allocation3 + $0xa8] sm:$0xff] }
 0x14e   : > { %v750_v48 = vadd.f32 %v734_v47, %v652_v13  ;;  %v747_v22 = vadd.f32 %v731_v27, %v649_v45  ;;  %v797_v37 = vsel %vm795_vm4, %v2334_v57, %v2338_v59  ;;  %v513_v57 = vsel %vm502_vm1, %v2324_v52, %v2320_v50  ;;  %v623_v59 = vld [vmem:[#allocation3 + $0xb0] sm:$0xff]  ;;  %v624_v13 = vld [vmem:[#allocation3 + $0xb8] sm:$0xff] }
 0x14f   : > { %v2356_v5 = vpop.permute.xlu0 %783  ;;  %v749_v34 = vadd.f32 %v733_v17, %v651_v44  ;;  %v611_v44 = vsel %vm599_vm2, %v2330_v55, %v2326_v53  ;;  %v603_v49 = vsel %vm599_vm2, %v2326_v53, %v2330_v55  ;;  %v831_v51 = vmul.f32 %v815_v41, %v805_v46  ;;  %v814_v17 = vld [vmem:[#allocation3 + $0x188] sm:$0xff] }
 0x150   : > { %v2354_v4 = vpop.permute.xlu1 %785  ;;  %3101 = vst [vmem:[#allocation19_spill] sm:$0xff] %v2356_v5  ;;  %v796_v50 = vsel %vm795_vm4, %v2336_v58, %v2340_v60  ;;  %v804_v52 = vsel %vm795_vm4, %v2340_v60, %v2336_v58  ;;  %v748_v18 = vadd.f32 %v732_v40, %v650_v31  ;;  %v602_v53 = vsel %vm599_vm2, %v2328_v54, %v2332_v56  ;;  %v868_v60 = vld [vmem:[#allocation3 + $0x230] sm:$0xff]  ;;  %v869_v31 = vld [vmem:[#allocation3 + $0x238] sm:$0xff] }
 0x151   : > { %v610_v55 = vsel %vm599_vm2, %v2332_v56, %v2328_v54  ;;  %v832_v45 = vmul.f32 %v816_v16, %v797_v37  ;;  %v541_v25 = vmul.f32 %v525_v43, %v514_v9  ;;  %v542_v26 = vmul.f32 %v526_v3, %v506_v15  ;;  %v721_v54 = vld [vmem:[#allocation3 + $0x130] sm:$0xff]  ;;  %v722_v9 = vld [vmem:[#allocation3 + $0x138] sm:$0xff] }
 0x152   : > { %v539_v27 = vmul.f32 %v523_v11, %v513_v57  ;;  %v639_v58 = vmul.f32 %v623_v59, %v611_v44  ;;  %v540_v41 = vmul.f32 %v524_v12, %v505_v42  ;;  %v640_v46 = vmul.f32 %v624_v13, %v603_v49  ;;  %v719_v11 = vld [vmem:[#allocation3 + $0x120] sm:$0xff]  ;;  %v720_v59 = vld [vmem:[#allocation3 + $0x128] sm:$0xff] }
 0x153   : > { %v2362_v8 = vpop.permute.xlu0 %910  ;;  %v709_v56 = vsel %vm697_vm3, %v2346_v63, %v2342_v61  ;;  %v848_v43 = vadd.f32 %v832_v45, %v750_v48  ;;  %v2483_v3 = vmul.f32 %v868_v60, %v2196_v32  ;;  %v2486_v15 = vmul.f32 %v869_v31, %v2208_v35 }
 0x154   : > { %v2360_v7 = vpop.permute.xlu1 %912  ;;  %v655_v37 = vadd.f32 %v639_v58, %v541_v25  ;;  %v708_v48 = vsel %vm697_vm3, %v2348_v0, %v2344_v62  ;;  %v737_v57 = vmul.f32 %v721_v54, %v709_v56  ;;  %v1061_v54 = vld [vmem:[#allocation3 + $0x318] sm:$0xff] }
 0x157   : > { %v2376_v20 = vpop.permute.xlu0 %926 }
 0x158   : > { %v2366_v10 = vpop.permute.xlu1 %928 }
 0x15b   : > { %v2391_v5 = vpop.permute.xlu0 %1008 }
 0x15c   : > { %v2385_v39 = vpop.permute.xlu1 %1010  ;;  %3103 = vst [vmem:[#allocation21_spill] sm:$0xff] %v2391_v5  ;;  %v866_v5 = vld [vmem:[#allocation3 + $0x220] sm:$0xff] }
 0x15d   : > { %3102 = vst [vmem:[#allocation20_spill] sm:$0xff] %v2385_v39  ;;  %v638_v39 = vmul.f32 %v622_v21, %v602_v53  ;;  %v2499_v32 = vmul.f32 %v866_v5, %v2199_v33  ;;  %v735_v5 = vmul.f32 %v719_v11, %v708_v48  ;;  %v3108_v21 = vld [vmem:[#allocation19_spill] sm:$0xff]  ;;  %v1059_v11 = vld [vmem:[#allocation3 + $0x308] sm:$0xff] }
 0x15f   : > { %v2406_v28 = vpop.permute.xlu0 %1024  ;;  %v654_v13 = vadd.f32 %v638_v39, %v540_v41  ;;  %v960_v39 = vld [vmem:[#allocation3 + $0x280] sm:$0xff] }
 0x160   : > { %v2400_v24 = vpop.permute.xlu1 %1026  ;;  %3105 = vst [vmem:[#allocation23_spill] sm:$0xff] %v2406_v28  ;;  %v637_v28 = vmul.f32 %v621_v19, %v610_v55  ;;  %v807_v19 = vsel %vm795_vm4, %v2354_v4, %v2350_v1  ;;  %v817_v55 = vld [vmem:[#allocation3 + $0x1a0] sm:$0xff] }
 0x161   : > { %3104 = vst [vmem:[#allocation22_spill] sm:$0xff] %v2400_v24  ;;  %v847_v24 = vadd.f32 %v831_v51, %v749_v34  ;;  %v701_v34 = vsel %vm697_vm3, %v2342_v61, %v2346_v63  ;;  %v700_v61 = vsel %vm697_vm3, %v2344_v62, %v2348_v0  ;;  %v656_v63 = vadd.f32 %v640_v46, %v542_v26  ;;  %v962_v51 = vld [vmem:[#allocation3 + $0x290] sm:$0xff]  ;;  %v963_v62 = vld [vmem:[#allocation3 + $0x298] sm:$0xff] }
 0x162   : > { %v653_v44 = vadd.f32 %v637_v28, %v539_v27  ;;  %v738_v33 = vmul.f32 %v722_v9, %v701_v34  ;;  %v952_v0 = vsel %vm942_vm5, %v2366_v10, %v2360_v7  ;;  %v943_v28 = vsel %vm942_vm5, %v2362_v8, %v2376_v20  ;;  %v1060_v27 = vld [vmem:[#allocation3 + $0x310] sm:$0xff]  ;;  %v1058_v34 = vld [vmem:[#allocation3 + $0x300] sm:$0xff] }
 0x163   : > { %v2435_v38 = vpop.permute.xlu0 %914  ;;  %v896_v49 = vadd.f32 %v2409_v29, %v847_v24  ;;  %v961_v24 = vld [vmem:[#allocation3 + $0x288] sm:$0xff]  ;;  %v951_v29 = vsel %vm942_vm5, %v2376_v20, %v2362_v8  ;;  %v979_v45 = vmul.f32 %v963_v62, %v952_v0  ;;  %v976_v25 = vmul.f32 %v960_v39, %v943_v28  ;;  %v1158_v39 = vld [vmem:[#allocation3 + $0x390] sm:$0xff] }
 0x164   : > { %v2424_v23 = vpop.permute.xlu1 %916  ;;  %3107 = vst [vmem:[#allocation25_spill] sm:$0xff] %v2435_v38  ;;  %v829_v38 = vmul.f32 %v813_v14, %v804_v52  ;;  %v736_v14 = vmul.f32 %v720_v59, %v700_v61  ;;  %v819_v52 = vld [vmem:[#allocation3 + $0x1b0] sm:$0xff]  ;;  %v3109_v8 = vld [vmem:[#allocation18_spill] sm:$0xff]  ;;  %v977_v26 = vmul.f32 %v961_v24, %v951_v29  ;;  %v3111_v60 = vld [vmem:[#allocation20_spill] sm:$0xff]  ;;  %v754_v31 = vadd.f32 %v738_v33, %v656_v63 }
 0x165   : > { %3106 = vst [vmem:[#allocation24_spill] sm:$0xff] %v2424_v23  ;;  %v830_v23 = vmul.f32 %v814_v17, %v796_v50  ;;  %v753_v17 = vadd.f32 %v737_v57, %v655_v37  ;;  %v799_v50 = vsel %vm795_vm4, %v2350_v1, %v2354_v4  ;;  %v798_v20 = vsel %vm795_vm4, %v3109_v8, %v3108_v21  ;;  %v1159_v24 = vld [vmem:[#allocation3 + $0x398] sm:$0xff] }
 0x166   : > { %v845_v12 = vadd.f32 %v829_v38, %v747_v22  ;;  %v897_v22 = vadd.f32 %v2412_v36, %v848_v43  ;;  %v806_v53 = vsel %vm795_vm4, %v3108_v21, %v3109_v8  ;;  %v751_v41 = vadd.f32 %v735_v5, %v653_v44 }
 0x167   : > { %v2475_v40 = vpop.permute.xlu0 %930  ;;  %v846_v42 = vadd.f32 %v830_v23, %v748_v18  ;;  %v944_v23 = vsel %vm942_vm5, %v2360_v7, %v2366_v10  ;;  %v820_v18 = vld [vmem:[#allocation3 + $0x1b8] sm:$0xff]  ;;  %v752_v46 = vadd.f32 %v736_v14, %v654_v13  ;;  %v835_v37 = vmul.f32 %v819_v52, %v807_v19  ;;  %v3112_v48 = vld [vmem:[#allocation23_spill] sm:$0xff] }
 0x168   : > { %v2473_v47 = vpop.permute.xlu1 %932  ;;  %v894_v10 = vadd.f32 %v2418_v30, %v845_v12  ;;  %v818_v30 = vld [vmem:[#allocation3 + $0x1a8] sm:$0xff]  ;;  %v836_v9 = vmul.f32 %v820_v18, %v799_v50  ;;  %v3113_v12 = vld [vmem:[#allocation21_spill] sm:$0xff]  ;;  %v833_v59 = vmul.f32 %v817_v55, %v806_v53  ;;  %v995_v13 = vadd.f32 %v979_v45, %v897_v22 }
 0x169   : > { %v895_v7 = vadd.f32 %v2415_v2, %v846_v42  ;;  %v978_v2 = vmul.f32 %v962_v51, %v944_v23  ;;  %v3110_v58 = vld [vmem:[#allocation22_spill] sm:$0xff]  ;;  %v1041_v42 = vsel %vm1040_vm6, %v3113_v12, %v3112_v48  ;;  %v1049_v57 = vsel %vm1040_vm6, %v3112_v48, %v3113_v12 }
 0x16a   : > { %v1042_v1 = vsel %vm1040_vm6, %v3111_v60, %v3110_v58  ;;  %v1050_v56 = vsel %vm1040_vm6, %v3110_v58, %v3111_v60  ;;  %v834_v61 = vmul.f32 %v818_v30, %v798_v20  ;;  %v992_v33 = vadd.f32 %v976_v25, %v894_v10  ;;  %v867_v23 = vld [vmem:[#allocation3 + $0x228] sm:$0xff]  ;;  %v3114_v20 = vld [vmem:[#allocation17_spill] sm:$0xff] }
 0x16b   : > { %v2501_v35 = vpop.permute.xlu0 %1106  ;;  %v994_v63 = vadd.f32 %v978_v2, %v896_v49  ;;  %v1076_v44 = vmul.f32 %v1060_v27, %v1042_v1  ;;  %v993_v5 = vadd.f32 %v977_v26, %v895_v7  ;;  %v1077_v51 = vmul.f32 %v1061_v54, %v1050_v56  ;;  %v1156_v7 = vld [vmem:[#allocation3 + $0x380] sm:$0xff]  ;;  %v1157_v10 = vld [vmem:[#allocation3 + $0x388] sm:$0xff]  ;;  %v967_v1 = vld [vmem:[#allocation3 + $0x2b8] sm:$0xff] }
 0x16c   : > { %v2488_v16 = vpop.permute.xlu1 %1108  ;;  %v1074_v62 = vmul.f32 %v1058_v34, %v1041_v42  ;;  %v1075_v0 = vmul.f32 %v1059_v11, %v1049_v57  ;;  %v851_v22 = vadd.f32 %v835_v37, %v753_v17  ;;  %v852_v50 = vadd.f32 %v836_v9, %v754_v31  ;;  %v3115_v17 = vld [vmem:[#allocation24_spill] sm:$0xff]  ;;  %v1256_v56 = vld [vmem:[#allocation3 + $0x410] sm:$0xff]  ;;  %v964_v9 = vld [vmem:[#allocation3 + $0x2a0] sm:$0xff] }
 0x16d   : > { %v849_v19 = vadd.f32 %v833_v59, %v751_v41  ;;  %v850_v21 = vadd.f32 %v834_v61, %v752_v46  ;;  %v1092_v8 = vadd.f32 %v1076_v44, %v994_v63  ;;  %v883_v53 = vmul.f32 %v867_v23, %v3114_v20  ;;  %v1257_v37 = vld [vmem:[#allocation3 + $0x418] sm:$0xff]  ;;  %v3116_v34 = vld [vmem:[#allocation25_spill] sm:$0xff]  ;;  %v1255_v12 = vld [vmem:[#allocation3 + $0x408] sm:$0xff] }
 0x16e   : > { %v946_v2 = vsel %vm942_vm5, %v3115_v17, %v2473_v47  ;;  %v1090_v25 = vadd.f32 %v1074_v62, %v992_v33  ;;  %v1091_v26 = vadd.f32 %v1075_v0, %v993_v5  ;;  %v901_v60 = vadd.f32 %v2486_v15, %v852_v50 }
 0x16f   : > { %v1123_v36 = vpop.permute.xlu0 %1122  ;;  %v954_v31 = vsel %vm942_vm5, %v2473_v47, %v3115_v17  ;;  %v898_v46 = vadd.f32 %v2499_v32, %v849_v19  ;;  %v899_v54 = vadd.f32 %v883_v53, %v850_v21  ;;  %v953_v15 = vsel %vm942_vm5, %v2475_v40, %v3116_v34  ;;  %v1254_v47 = vld [vmem:[#allocation3 + $0x400] sm:$0xff]  ;;  %v965_v32 = vld [vmem:[#allocation3 + $0x2a8] sm:$0xff] }
 0x170   : > { %v1125_v38 = vpop.permute.xlu1 %1124  ;;  %v1139_v52 = vsel %vm1138_vm7, %v2501_v35, %v1123_v36  ;;  %v1147_v18 = vsel %vm1138_vm7, %v1123_v36, %v2501_v35  ;;  %v900_v36 = vadd.f32 %v2483_v3, %v851_v22  ;;  %v945_v3 = vsel %vm942_vm5, %v3116_v34, %v2475_v40  ;;  %v1062_v53 = vld [vmem:[#allocation3 + $0x320] sm:$0xff] }
 0x171   : > { %v1140_v28 = vsel %vm1138_vm7, %v2488_v16, %v1125_v38  ;;  %v1148_v49 = vsel %vm1138_vm7, %v1125_v38, %v2488_v16  ;;  %v1093_v16 = vadd.f32 %v1077_v51, %v995_v13  ;;  %v966_v38 = vld [vmem:[#allocation3 + $0x2b0] sm:$0xff]  ;;  %v1172_v27 = vmul.f32 %v1156_v7, %v1139_v52  ;;  %v1065_v52 = vld [vmem:[#allocation3 + $0x338] sm:$0xff] }
 0x172   : > { %v1174_v55 = vmul.f32 %v1158_v39, %v1140_v28  ;;  %v1175_v30 = vmul.f32 %v1159_v24, %v1148_v49  ;;  %v1173_v58 = vmul.f32 %v1157_v10, %v1147_v18  ;;  %v982_v41 = vmul.f32 %v966_v38, %v946_v2  ;;  %v1064_v28 = vld [vmem:[#allocation3 + $0x330] sm:$0xff] }
 0x173   : > { %v2554_v43 = vpop.permute.xlu0 %1012  ;;  %v1188_v57 = vadd.f32 %v1172_v27, %v1090_v25  ;;  %v983_v51 = vmul.f32 %v967_v1, %v954_v31  ;;  %v980_v23 = vmul.f32 %v964_v9, %v945_v3  ;;  %v981_v24 = vmul.f32 %v965_v32, %v953_v15 }
 0x174   : > { %v2548_v4 = vpop.permute.xlu1 %1014  ;;  %v1190_v11 = vadd.f32 %v1174_v55, %v1092_v8  ;;  %v1191_v42 = vadd.f32 %v1175_v30, %v1093_v16  ;;  %v1189_v44 = vadd.f32 %v1173_v58, %v1091_v26  ;;  %v998_v20 = vadd.f32 %v982_v41, %v900_v36  ;;  %v1063_v16 = vld [vmem:[#allocation3 + $0x328] sm:$0xff]  ;;  %v1163_v36 = vld [vmem:[#allocation3 + $0x3b8] sm:$0xff]  ;;  %v1160_v41 = vld [vmem:[#allocation3 + $0x3a0] sm:$0xff] }
 0x175   : > { %v999_v2 = vadd.f32 %v983_v51, %v901_v60  ;;  %v997_v25 = vadd.f32 %v981_v24, %v899_v54 }
 0x177   : > { %v2572_v29 = vpop.permute.xlu0 %1028 }
 0x178   : > { %v2564_v14 = vpop.permute.xlu1 %1030  ;;  %v1043_v38 = vsel %vm1040_vm6, %v2554_v43, %v2572_v29  ;;  %v1051_v17 = vsel %vm1040_vm6, %v2572_v29, %v2554_v43  ;;  %v1162_v29 = vld [vmem:[#allocation3 + $0x3b0] sm:$0xff] }
 0x179   : > { %v1044_v49 = vsel %vm1040_vm6, %v2548_v4, %v2564_v14  ;;  %v1052_v18 = vsel %vm1040_vm6, %v2564_v14, %v2548_v4  ;;  %v1079_v43 = vmul.f32 %v1063_v16, %v1051_v17 }
 0x17a   : > { %v1080_v55 = vmul.f32 %v1064_v28, %v1044_v49  ;;  %v1081_v26 = vmul.f32 %v1065_v52, %v1052_v18 }
 0x17b   : > { %v1205_v35 = vpop.permute.xlu0 %1204 }
 0x17c   : > { %v1207_v45 = vpop.permute.xlu1 %1206  ;;  %v1097_v34 = vadd.f32 %v1081_v26, %v999_v2 }
 0x17f   : > { %v1221_v63 = vpop.permute.xlu0 %1220 }
 0x180   : > { %v1223_v48 = vpop.permute.xlu1 %1222  ;;  %v1237_v40 = vsel %vm1236_vm8, %v1205_v35, %v1221_v63  ;;  %v1245_v5 = vsel %vm1236_vm8, %v1221_v63, %v1205_v35  ;;  %v1078_v35 = vmul.f32 %v1062_v53, %v1043_v38 }
 0x181   : > { %v1238_v59 = vsel %vm1236_vm8, %v1207_v45, %v1223_v48  ;;  %v1246_v61 = vsel %vm1236_vm8, %v1223_v48, %v1207_v45  ;;  %v1270_v0 = vmul.f32 %v1254_v47, %v1237_v40  ;;  %v1271_v39 = vmul.f32 %v1255_v12, %v1245_v5  ;;  %v1258_v40 = vld [vmem:[#allocation3 + $0x420] sm:$0xff]  ;;  %v1259_v5 = vld [vmem:[#allocation3 + $0x428] sm:$0xff] }
 0x182   : > { %v1272_v13 = vmul.f32 %v1256_v56, %v1238_v59  ;;  %v1273_v33 = vmul.f32 %v1257_v37, %v1246_v61  ;;  %v996_v45 = vadd.f32 %v980_v23, %v898_v46  ;;  %v1161_v46 = vld [vmem:[#allocation3 + $0x3a8] sm:$0xff]  ;;  %v1096_v37 = vadd.f32 %v1080_v55, %v998_v20  ;;  %v1260_v59 = vld [vmem:[#allocation3 + $0x430] sm:$0xff]  ;;  %v1261_v61 = vld [vmem:[#allocation3 + $0x438] sm:$0xff] }
 0x183   : > { %v2609_v62 = vpop.f32.mrb[0].mxu0  ;;  %v1287_v19 = vadd.f32 %v1271_v39, %v1189_v44  ;;  %v1286_v21 = vadd.f32 %v1270_v0, %v1188_v57  ;;  %v1111_v8 = vpop.permute.xlu0 %1110  ;;  %v1095_v12 = vadd.f32 %v1079_v43, %v997_v25 }
 0x184   : > { %v2615_v22 = vpop.f32.mrb[1].mxu0  ;;  %476 = vrot.lane.b32.xlu0 %v2609_v62, %s1877_s9  ;;  %v1289_v50 = vadd.f32 %v1273_v33, %v1191_v42  ;;  %v1288_v7 = vadd.f32 %v1272_v13, %v1190_v11  ;;  %v1113_v10 = vpop.permute.xlu1 %1112  ;;  %v1094_v47 = vadd.f32 %v1078_v35, %v996_v45 }
 0x186   : > { %v1567_v4 = vpack.c.bf16 %v1289_v50, %v1287_v19  ;;  %v1569_v14 = vpack.c.bf16 %v1288_v7, %v1286_v21 }
 0x187   : > { %v2631_v30 = vpop.f32.mrb[2].mxu0  ;;  %v1127_v31 = vpop.permute.xlu0 %1126 }
 0x188   : > { %v2633_v27 = vpop.f32.mrb[3].mxu0  ;;  %478 = vrot.lane.b32.xlu1 %v2631_v30, %s1877_s9  ;;  %575 = vrot.lane.b32.xlu0 %v2609_v62, %s1878_s21  ;;  %v1129_v58 = vpop.permute.xlu1 %1128  ;;  %v1141_v54 = vsel %vm1138_vm7, %v1111_v8, %v1127_v31  ;;  %v1149_v56 = vsel %vm1138_vm7, %v1127_v31, %v1111_v8 }
 0x189   : > { %1568 = vmatprep.subr.bf16.mxu1 %v1567_v4  ;;  %v1142_v60 = vsel %vm1138_vm7, %v1113_v10, %v1129_v58  ;;  %v1150_v1 = vsel %vm1138_vm7, %v1129_v58, %v1113_v10  ;;  %v1176_v42 = vmul.f32 %v1160_v41, %v1141_v54  ;;  %v1177_v32 = vmul.f32 %v1161_v46, %v1149_v56  ;;  %v625_v54 = vld [vmem:[#allocation3 + $0xc0] sm:$0xff]  ;;  %v626_v56 = vld [vmem:[#allocation3 + $0xc8] sm:$0xff] }
 0x18a   : > { %1570 = vmatpush1.bf16.msra.mxu1 %v1569_v14  ;;  %v1178_v3 = vmul.f32 %v1162_v29, %v1142_v60  ;;  %v1179_v15 = vmul.f32 %v1163_v36, %v1150_v1 }
 0x18b   : > { %v2647_v9 = vpop.f32.mrb[4].mxu0  ;;  %v1209_v57 = vpop.permute.xlu0 %1208  ;;  %v1192_v23 = vadd.f32 %v1176_v42, %v1094_v47  ;;  %v1193_v0 = vadd.f32 %v1177_v32, %v1095_v12  ;;  %v529_v12 = vld [vmem:[#allocation3 + $0x50] sm:$0xff]  ;;  %v530_v42 = vld [vmem:[#allocation3 + $0x58] sm:$0xff] }
 0x18c   : > { %577 = vrot.lane.b32.xlu1 %v2631_v30, %s1878_s21  ;;  %673 = vrot.lane.b32.xlu0 %v2609_v62, %s1879_s13  ;;  %v1211_v11 = vpop.permute.xlu1 %1210  ;;  %v2653_v48 = vpop.f32.mrb[5].mxu0  ;;  %v1194_v44 = vadd.f32 %v1178_v3, %v1096_v37  ;;  %v1195_v13 = vadd.f32 %v1179_v15, %v1097_v34  ;;  %v527_v3 = vld [vmem:[#allocation3 + $0x40] sm:$0xff]  ;;  %v528_v15 = vld [vmem:[#allocation3 + $0x48] sm:$0xff] }
 0x18f   : > { %v2655_v63 = vpop.f32.mrb[6].mxu0  ;;  %v1225_v28 = vpop.permute.xlu0 %1224 }
 0x190   : > { %675 = vrot.lane.b32.xlu1 %v2631_v30, %s1879_s13  ;;  %771 = vrot.lane.b32.xlu0 %v2609_v62, %s1880_s20  ;;  %v1227_v33 = vpop.permute.xlu1 %1226  ;;  %v2661_v51 = vpop.f32.mrb[7].mxu0  ;;  %v1239_v7 = vsel %vm1236_vm8, %v1209_v57, %v1225_v28  ;;  %v1247_v10 = vsel %vm1236_vm8, %v1225_v28, %v1209_v57 }
 0x191   : > { %v1240_v39 = vsel %vm1236_vm8, %v1211_v11, %v1227_v33  ;;  %v1248_v24 = vsel %vm1236_vm8, %v1227_v33, %v1211_v11  ;;  %v1274_v52 = vmul.f32 %v1258_v40, %v1239_v7  ;;  %v1275_v18 = vmul.f32 %v1259_v5, %v1247_v10  ;;  %v725_v7 = vld [vmem:[#allocation3 + $0x150] sm:$0xff] }
 0x192   : > { %v1276_v49 = vmul.f32 %v1260_v59, %v1240_v39  ;;  %v1277_v50 = vmul.f32 %v1261_v61, %v1248_v24  ;;  %v724_v39 = vld [vmem:[#allocation3 + $0x148] sm:$0xff] }
 0x193   : > { %v1290_v8 = vadd.f32 %v1274_v52, %v1192_v23  ;;  %v1291_v20 = vadd.f32 %v1275_v18, %v1193_v0  ;;  %v723_v0 = vld [vmem:[#allocation3 + $0x140] sm:$0xff] }
 0x194   : > { %773 = vrot.lane.b32.xlu1 %v2631_v30, %s1880_s20  ;;  %918 = vrot.lane.b32.xlu0 %v2609_v62, %s1881_s22  ;;  %v1292_v19 = vadd.f32 %v1276_v49, %v1194_v44  ;;  %v1293_v21 = vadd.f32 %v1277_v50, %v1195_v13  ;;  %v627_v44 = vld [vmem:[#allocation3 + $0xd0] sm:$0xff]  ;;  %v628_v13 = vld [vmem:[#allocation3 + $0xd8] sm:$0xff] }
 0x196   : > { %v1571_v53 = vpack.c.bf16 %v1293_v21, %v1291_v20  ;;  %v1573_v16 = vpack.c.bf16 %v1292_v19, %v1290_v8  ;;  %v726_v21 = vld [vmem:[#allocation3 + $0x158] sm:$0xff]  ;;  %v821_v8 = vld [vmem:[#allocation3 + $0x1c0] sm:$0xff]  ;;  %v822_v20 = vld [vmem:[#allocation3 + $0x1c8] sm:$0xff] }
 0x198   : > { %920 = vrot.lane.b32.xlu1 %v2631_v30, %s1881_s22  ;;  %1016 = vrot.lane.b32.xlu0 %v2609_v62, %s1882_s29 }
 0x199   : > { %1572 = vmatprep.subr.bf16.mxu1 %v1571_v53 }
 0x19a   : > { %1574 = vmatpush1.bf16.msra.mxu1 %v1573_v16 }
 0x19c   : > { %1018 = vrot.lane.b32.xlu1 %v2631_v30, %s1882_s29  ;;  %1114 = vrot.lane.b32.xlu0 %v2609_v62, %s1883_s8 }
 0x1a0   : > { %1116 = vrot.lane.b32.xlu1 %v2631_v30, %s1883_s8  ;;  %1212 = vrot.lane.b32.xlu0 %v2609_v62, %s1884_s30 }
 0x1a4   : > { %1214 = vrot.lane.b32.xlu1 %v2631_v30, %s1884_s30  ;;  %492 = vrot.lane.b32.xlu0 %v2615_v22, %s1877_s9 }
 0x1a8   : > { %494 = vrot.lane.b32.xlu1 %v2633_v27, %s1877_s9  ;;  %591 = vrot.lane.b32.xlu0 %v2615_v22, %s1878_s21 }
 0x1ac   : > { %593 = vrot.lane.b32.xlu1 %v2633_v27, %s1878_s21  ;;  %689 = vrot.lane.b32.xlu0 %v2615_v22, %s1879_s13 }
 0x1b0   : > { %691 = vrot.lane.b32.xlu1 %v2633_v27, %s1879_s13  ;;  %787 = vrot.lane.b32.xlu0 %v2615_v22, %s1880_s20 }
 0x1b4   : > { %789 = vrot.lane.b32.xlu1 %v2633_v27, %s1880_s20  ;;  %934 = vrot.lane.b32.xlu0 %v2615_v22, %s1881_s22 }
 0x1b8   : > { %936 = vrot.lane.b32.xlu1 %v2633_v27, %s1881_s22  ;;  %1032 = vrot.lane.b32.xlu0 %v2615_v22, %s1882_s29 }
 0x1bc   : > { %1034 = vrot.lane.b32.xlu1 %v2633_v27, %s1882_s29  ;;  %1130 = vrot.lane.b32.xlu0 %v2615_v22, %s1883_s8 }
 0x1c0   : > { %1132 = vrot.lane.b32.xlu1 %v2633_v27, %s1883_s8  ;;  %1228 = vrot.lane.b32.xlu0 %v2615_v22, %s1884_s30 }
 0x1c4   : > { %1230 = vrot.lane.b32.xlu1 %v2633_v27, %s1884_s30  ;;  %480 = vrot.lane.b32.xlu0 %v2647_v9, %s1877_s9 }
 0x1c8   : > { %482 = vrot.lane.b32.xlu1 %v2655_v63, %s1877_s9  ;;  %579 = vrot.lane.b32.xlu0 %v2647_v9, %s1878_s21 }
 0x1cc   : > { %581 = vrot.lane.b32.xlu1 %v2655_v63, %s1878_s21  ;;  %677 = vrot.lane.b32.xlu0 %v2647_v9, %s1879_s13 }
 0x1d0   : > { %679 = vrot.lane.b32.xlu1 %v2655_v63, %s1879_s13  ;;  %775 = vrot.lane.b32.xlu0 %v2647_v9, %s1880_s20 }
 0x1d4   : > { %777 = vrot.lane.b32.xlu1 %v2655_v63, %s1880_s20  ;;  %922 = vrot.lane.b32.xlu0 %v2647_v9, %s1881_s22 }
 0x1d8   : > { %924 = vrot.lane.b32.xlu1 %v2655_v63, %s1881_s22  ;;  %1020 = vrot.lane.b32.xlu0 %v2647_v9, %s1882_s29 }
 0x1dc   : > { %1022 = vrot.lane.b32.xlu1 %v2655_v63, %s1882_s29  ;;  %1118 = vrot.lane.b32.xlu0 %v2647_v9, %s1883_s8 }
 0x1e0   : > { %1120 = vrot.lane.b32.xlu1 %v2655_v63, %s1883_s8  ;;  %496 = vrot.lane.b32.xlu0 %v2653_v48, %s1877_s9 }
 0x1e4   : > { %1218 = vrot.lane.b32.xlu1 %v2655_v63, %s1884_s30  ;;  %595 = vrot.lane.b32.xlu0 %v2653_v48, %s1878_s21 }
 0x1e8   : > { %498 = vrot.lane.b32.xlu1 %v2661_v51, %s1877_s9  ;;  %693 = vrot.lane.b32.xlu0 %v2653_v48, %s1879_s13  ;;  %s2998_s9 = scalar_lea.hbm %s3048_s6, %s1550_s14 }
 0x1ec   : > { %597 = vrot.lane.b32.xlu1 %v2661_v51, %s1878_s21  ;;  %791 = vrot.lane.b32.xlu0 %v2653_v48, %s1880_s20  ;;  %s1792_s21 = scalar_lea.vmem %s3000_s12, 256 }
 0x1ed   : > { %p1793_p7 = scmp.ne.s32.totalorder %s3000_s12, %s1792_s21 }
 0x1ef   : > { %p1794_p0 = pnand %p1793_p7, %p3117_p9 }
 0x1f0   : > { %695 = vrot.lane.b32.xlu1 %v2661_v51, %s1879_s13  ;;  %938 = vrot.lane.b32.xlu0 %v2653_v48, %s1881_s22  ;;  %s1798_s13 = scalar_lea.vmem %s1797_s15, 512 }
 0x1f1   : > { %p1795_p11 = pneg %p1794_p0  ;;  %p1800_p10 = scmp.lt.s32.totalorder %s1798_s13, %s1792_s21 }
 0x1f3   : > { %p1801_p1 = por %p1800_p10, %p1799_p8 }
 0x1f4   : > { %793 = vrot.lane.b32.xlu1 %v2661_v51, %s1880_s20  ;;  %1036 = vrot.lane.b32.xlu0 %v2653_v48, %s1882_s29 }
 0x1f5   : > { %p1802_p4 = pnand %p1801_p1, %p1795_p11 }
 0x1f6   : > { %v477_v38 = vpop.permute.xlu0 %476 }
 0x1f8   : > { %940 = vrot.lane.b32.xlu1 %v2661_v51, %s1881_s22  ;;  %1134 = vrot.lane.b32.xlu0 %v2653_v48, %s1883_s8 }
 0x1fa   : > { %v479_v17 = vpop.permute.xlu1 %478  ;;  %v576_v2 = vpop.permute.xlu0 %575 }
 0x1fc   : > { %1038 = vrot.lane.b32.xlu1 %v2661_v51, %s1882_s29  ;;  %1216 = vrot.lane.b32.xlu0 %v2647_v9, %s1884_s30 }
 0x1fe   : > { %v578_v55 = vpop.permute.xlu1 %577  ;;  %v674_v4 = vpop.permute.xlu0 %673 }
 0x200   : > { %1136 = vrot.lane.b32.xlu1 %v2661_v51, %s1883_s8  ;;  %1232 = vrot.lane.b32.xlu0 %v2653_v48, %s1884_s30 }
 0x202   : > { %v676_v14 = vpop.permute.xlu1 %675  ;;  %v772_v45 = vpop.permute.xlu0 %771 }
 0x204   : > { %1234 = vrot.lane.b32.xlu1 %v2661_v51, %s1884_s30 }
 0x206   : > { %v2785_v25 = vpop.permute.xlu1 %773  ;;  %v2787_v26 = vpop.permute.xlu0 %918 }
 0x20a   : > { %v2789_v58 = vpop.permute.xlu1 %920  ;;  %v2791_v35 = vpop.permute.xlu0 %1016 }
 0x20e   : > { %v2793_v43 = vpop.permute.xlu1 %1018  ;;  %v2795_v29 = vpop.permute.xlu0 %1114 }
 0x212   : > { %v2797_v36 = vpop.permute.xlu1 %1116  ;;  %v2799_v60 = vpop.permute.xlu0 %1212 }
 0x216   : > { %v2801_v1 = vpop.permute.xlu1 %1214  ;;  %v493_v31 = vpop.permute.xlu0 %492 }
 0x217   : > { %v507_v11 = vsel %vm502_vm1, %v477_v38, %v493_v31  ;;  %v515_v47 = vsel %vm502_vm1, %v493_v31, %v477_v38 }
 0x218   : > { %v543_v49 = vmul.f32 %v527_v3, %v515_v47  ;;  %v544_v50 = vmul.f32 %v528_v15, %v507_v11  ;;  %v823_v11 = vld [vmem:[#allocation3 + $0x1d0] sm:$0xff]  ;;  %v824_v47 = vld [vmem:[#allocation3 + $0x1d8] sm:$0xff] }
 0x21a   : > { %v495_v41 = vpop.permute.xlu1 %494  ;;  %v592_v46 = vpop.permute.xlu0 %591 }
 0x21b   : > { %v604_v37 = vsel %vm599_vm2, %v576_v2, %v592_v46  ;;  %v612_v34 = vsel %vm599_vm2, %v592_v46, %v576_v2  ;;  %v508_v32 = vsel %vm502_vm1, %v479_v17, %v495_v41  ;;  %v516_v57 = vsel %vm502_vm1, %v495_v41, %v479_v17 }
 0x21c   : > { %v641_v59 = vmul.f32 %v625_v54, %v612_v34  ;;  %v642_v61 = vmul.f32 %v626_v56, %v604_v37  ;;  %v545_v10 = vmul.f32 %v529_v12, %v516_v57  ;;  %v546_v52 = vmul.f32 %v530_v42, %v508_v32  ;;  %v870_v57 = vld [vmem:[#allocation3 + $0x240] sm:$0xff] }
 0x21e   : > { %v594_v33 = vpop.permute.xlu1 %593  ;;  %v690_v40 = vpop.permute.xlu0 %689  ;;  %v657_v53 = vadd.f32 %v641_v59, %v543_v49  ;;  %v658_v16 = vadd.f32 %v642_v61, %v544_v50  ;;  %v871_v59 = vld [vmem:[#allocation3 + $0x248] sm:$0xff] }
 0x21f   : > { %v605_v5 = vsel %vm599_vm2, %v578_v55, %v594_v33  ;;  %v613_v23 = vsel %vm599_vm2, %v594_v33, %v578_v55  ;;  %v702_v24 = vsel %vm697_vm3, %v674_v4, %v690_v40  ;;  %v710_v28 = vsel %vm697_vm3, %v690_v40, %v674_v4 }
 0x220   : > { %v643_v18 = vmul.f32 %v627_v44, %v613_v23  ;;  %v644_v19 = vmul.f32 %v628_v13, %v605_v5  ;;  %v739_v38 = vmul.f32 %v723_v0, %v710_v28  ;;  %v740_v17 = vmul.f32 %v724_v39, %v702_v24  ;;  %v872_v0 = vld [vmem:[#allocation3 + $0x250] sm:$0xff]  ;;  %v873_v39 = vld [vmem:[#allocation3 + $0x258] sm:$0xff] }
 0x221   : > { %v886_v24 = vmul.f32 %v870_v57, %v2609_v62  ;;  %v887_v28 = vmul.f32 %v871_v59, %v2615_v22  ;;  %v889_v62 = vmul.f32 %v873_v39, %v2633_v27  ;;  %v971_v22 = vld [vmem:[#allocation3 + $0x2d8] sm:$0xff]  ;;  %v1067_v27 = vld [vmem:[#allocation3 + $0x348] sm:$0xff]  ;;  %v1166_v59 = vld [vmem:[#allocation3 + $0x3d0] sm:$0xff] }
 0x222   : > { %v692_v2 = vpop.permute.xlu1 %691  ;;  %v788_v55 = vpop.permute.xlu0 %787  ;;  %v659_v3 = vadd.f32 %v643_v18, %v545_v10  ;;  %v660_v15 = vadd.f32 %v644_v19, %v546_v52  ;;  %v755_v12 = vadd.f32 %v739_v38, %v657_v53  ;;  %v756_v42 = vadd.f32 %v740_v17, %v658_v16  ;;  %v969_v10 = vld [vmem:[#allocation3 + $0x2c8] sm:$0xff] }
 0x223   : > { %v703_v31 = vsel %vm697_vm3, %v676_v14, %v692_v2  ;;  %v711_v4 = vsel %vm697_vm3, %v692_v2, %v676_v14  ;;  %v800_v41 = vsel %vm795_vm4, %v772_v45, %v788_v55  ;;  %v808_v46 = vsel %vm795_vm4, %v788_v55, %v772_v45  ;;  %v1263_v39 = vld [vmem:[#allocation3 + $0x448] sm:$0xff] }
 0x224   : > { %v741_v54 = vmul.f32 %v725_v7, %v711_v4  ;;  %v742_v56 = vmul.f32 %v726_v21, %v703_v31  ;;  %v837_v37 = vmul.f32 %v821_v8, %v808_v46  ;;  %v838_v34 = vmul.f32 %v822_v20, %v800_v41  ;;  %v968_v7 = vld [vmem:[#allocation3 + $0x2c0] sm:$0xff]  ;;  %v970_v8 = vld [vmem:[#allocation3 + $0x2d0] sm:$0xff] }
 0x225   : > { %v888_v21 = vmul.f32 %v872_v0, %v2631_v30  ;;  %v1066_v4 = vld [vmem:[#allocation3 + $0x340] sm:$0xff] }
 0x226   : > { %v790_v32 = vpop.permute.xlu1 %789  ;;  %v935_v14 = vpop.permute.xlu0 %934  ;;  %v757_v61 = vadd.f32 %v741_v54, %v659_v3  ;;  %v758_v44 = vadd.f32 %v742_v56, %v660_v15  ;;  %v853_v33 = vadd.f32 %v837_v37, %v755_v12  ;;  %v854_v40 = vadd.f32 %v838_v34, %v756_v42  ;;  %v1068_v56 = vld [vmem:[#allocation3 + $0x350] sm:$0xff]  ;;  %v1069_v37 = vld [vmem:[#allocation3 + $0x358] sm:$0xff]  ;;  %v1164_v15 = vld [vmem:[#allocation3 + $0x3c0] sm:$0xff] }
 0x227   : > { %v801_v45 = vsel %vm795_vm4, %v2785_v25, %v790_v32  ;;  %v809_v13 = vsel %vm795_vm4, %v790_v32, %v2785_v25  ;;  %v947_v52 = vsel %vm942_vm5, %v2787_v26, %v935_v14  ;;  %v955_v25 = vsel %vm942_vm5, %v935_v14, %v2787_v26  ;;  %v1167_v14 = vld [vmem:[#allocation3 + $0x3d8] sm:$0xff]  ;;  %v1262_v0 = vld [vmem:[#allocation3 + $0x440] sm:$0xff] }
 0x228   : > { %v839_v5 = vmul.f32 %v823_v11, %v809_v13  ;;  %v840_v23 = vmul.f32 %v824_v47, %v801_v45  ;;  %v902_v16 = vadd.f32 %v886_v24, %v853_v33  ;;  %v903_v38 = vadd.f32 %v887_v28, %v854_v40  ;;  %v1165_v11 = vld [vmem:[#allocation3 + $0x3c8] sm:$0xff] }
 0x229   : > { %v984_v17 = vmul.f32 %v968_v7, %v947_v52  ;;  %v985_v26 = vmul.f32 %v969_v10, %v955_v25  ;;  %v1264_v52 = vld [vmem:[#allocation3 + $0x450] sm:$0xff]  ;;  %v1265_v25 = vld [vmem:[#allocation3 + $0x458] sm:$0xff] }
 0x22a   : > { %v855_v49 = vadd.f32 %v839_v5, %v757_v61  ;;  %v856_v50 = vadd.f32 %v840_v23, %v758_v44  ;;  %v937_v18 = vpop.permute.xlu1 %936  ;;  %v1033_v19 = vpop.permute.xlu0 %1032 }
 0x22b   : > { %v948_v20 = vsel %vm942_vm5, %v2789_v58, %v937_v18  ;;  %v956_v53 = vsel %vm942_vm5, %v937_v18, %v2789_v58  ;;  %v1045_v41 = vsel %vm1040_vm6, %v2791_v35, %v1033_v19  ;;  %v1053_v46 = vsel %vm1040_vm6, %v1033_v19, %v2791_v35 }
 0x22c   : > { %v904_v2 = vadd.f32 %v888_v21, %v855_v49  ;;  %v905_v55 = vadd.f32 %v889_v62, %v856_v50  ;;  %v986_v31 = vmul.f32 %v970_v8, %v948_v20  ;;  %v987_v30 = vmul.f32 %v971_v22, %v956_v53 }
 0x22d   : > { %v1000_v12 = vadd.f32 %v984_v17, %v902_v16  ;;  %v1001_v42 = vadd.f32 %v985_v26, %v903_v38  ;;  %v1082_v32 = vmul.f32 %v1066_v4, %v1045_v41  ;;  %v1083_v57 = vmul.f32 %v1067_v27, %v1053_v46 }
 0x22e   : > { %v1035_v54 = vpop.permute.xlu1 %1034  ;;  %v1131_v58 = vpop.permute.xlu0 %1130  ;;  %v1002_v61 = vadd.f32 %v986_v31, %v904_v2  ;;  %v1003_v44 = vadd.f32 %v987_v30, %v905_v55 }
 0x22f   : > { %v1046_v34 = vsel %vm1040_vm6, %v2793_v43, %v1035_v54  ;;  %v1054_v3 = vsel %vm1040_vm6, %v1035_v54, %v2793_v43  ;;  %v1143_v47 = vsel %vm1138_vm7, %v2795_v29, %v1131_v58  ;;  %v1151_v35 = vsel %vm1138_vm7, %v1131_v58, %v2795_v29 }
 0x230   : > { %v1084_v45 = vmul.f32 %v1068_v56, %v1046_v34  ;;  %v1085_v43 = vmul.f32 %v1069_v37, %v1054_v3  ;;  %v1180_v40 = vmul.f32 %v1164_v15, %v1143_v47  ;;  %v1181_v5 = vmul.f32 %v1165_v11, %v1151_v35 }
 0x231   : > { %v1098_v7 = vadd.f32 %v1082_v32, %v1000_v12  ;;  %v1099_v10 = vadd.f32 %v1083_v57, %v1001_v42 }
 0x232   : > { %v1133_v13 = vpop.permute.xlu1 %1132  ;;  %v1229_v33 = vpop.permute.xlu0 %1228  ;;  %v1100_v18 = vadd.f32 %v1084_v45, %v1002_v61  ;;  %v1101_v19 = vadd.f32 %v1085_v43, %v1003_v44  ;;  %v630_v61 = vld [vmem:[#allocation3 + $0xe8] sm:$0xff]  ;;  %v531_v43 = vld [vmem:[#allocation3 + $0x60] sm:$0xff] }
 0x233   : > { %v1144_v23 = vsel %vm1138_vm7, %v2797_v36, %v1133_v13  ;;  %v1152_v29 = vsel %vm1138_vm7, %v1133_v13, %v2797_v36  ;;  %v1241_v49 = vsel %vm1236_vm8, %v2799_v60, %v1229_v33  ;;  %v1249_v50 = vsel %vm1236_vm8, %v1229_v33, %v2799_v60  ;;  %v532_v13 = vld [vmem:[#allocation3 + $0x68] sm:$0xff] }
 0x234   : > { %v1182_v24 = vmul.f32 %v1166_v59, %v1144_v23  ;;  %v1183_v28 = vmul.f32 %v1167_v14, %v1152_v29  ;;  %v1278_v21 = vmul.f32 %v1262_v0, %v1241_v49  ;;  %v1279_v36 = vmul.f32 %v1263_v39, %v1249_v50  ;;  %v629_v14 = vld [vmem:[#allocation3 + $0xe0] sm:$0xff]  ;;  %v728_v0 = vld [vmem:[#allocation3 + $0x168] sm:$0xff]  ;;  %v631_v50 = vld [vmem:[#allocation3 + $0xf0] sm:$0xff] }
 0x235   : > { %v1196_v22 = vadd.f32 %v1180_v40, %v1098_v7  ;;  %v1197_v20 = vadd.f32 %v1181_v5, %v1099_v10  ;;  %v727_v29 = vld [vmem:[#allocation3 + $0x160] sm:$0xff]  ;;  %v632_v7 = vld [vmem:[#allocation3 + $0xf8] sm:$0xff] }
 0x236   : > { %v1231_v62 = vpop.permute.xlu1 %1230  ;;  %v481_v8 = vpop.permute.xlu0 %480  ;;  %v1198_v16 = vadd.f32 %v1182_v24, %v1100_v18  ;;  %v1199_v38 = vadd.f32 %v1183_v28, %v1101_v19  ;;  %v825_v19 = vld [vmem:[#allocation3 + $0x1e0] sm:$0xff] }
 0x237   : > { %v1242_v53 = vsel %vm1236_vm8, %v2801_v1, %v1231_v62  ;;  %v1250_v60 = vsel %vm1236_vm8, %v1231_v62, %v2801_v1  ;;  %v1294_v2 = vadd.f32 %v1278_v21, %v1196_v22  ;;  %v1295_v55 = vadd.f32 %v1279_v36, %v1197_v20  ;;  %v826_v21 = vld [vmem:[#allocation3 + $0x1e8] sm:$0xff]  ;;  %v534_v22 = vld [vmem:[#allocation3 + $0x78] sm:$0xff] }
 0x238   : > { %v1280_v17 = vmul.f32 %v1264_v52, %v1242_v53  ;;  %v1281_v26 = vmul.f32 %v1265_v25, %v1250_v60 }
 0x23a   : > { %v1296_v31 = vadd.f32 %v1280_v17, %v1198_v16  ;;  %v1297_v30 = vadd.f32 %v1281_v26, %v1199_v38  ;;  %v483_v4 = vpop.permute.xlu1 %482  ;;  %v580_v27 = vpop.permute.xlu0 %579 }
 0x23c   : > { %v1575_v41 = vpack.c.bf16 %v1297_v30, %v1295_v55  ;;  %v1577_v46 = vpack.c.bf16 %v1296_v31, %v1294_v2  ;;  %v729_v55 = vld [vmem:[#allocation3 + $0x170] sm:$0xff]  ;;  %v730_v31 = vld [vmem:[#allocation3 + $0x178] sm:$0xff] }
 0x23e   : > { %v582_v54 = vpop.permute.xlu1 %581  ;;  %v678_v58 = vpop.permute.xlu0 %677  ;;  %1576 = vmatprep.subr.bf16.mxu1 %v1575_v41 }
 0x23f   : > { %1578 = vmatpush1.bf16.msra.mxu1 %v1577_v46 }
 0x242   : > { %v680_v56 = vpop.permute.xlu1 %679  ;;  %v776_v37 = vpop.permute.xlu0 %775 }
 0x246   : > { %v2889_v34 = vpop.permute.xlu1 %777  ;;  %v2891_v1 = vpop.permute.xlu0 %922 }
 0x24a   : > { %v2893_v3 = vpop.permute.xlu1 %924  ;;  %v2895_v15 = vpop.permute.xlu0 %1020 }
 0x24e   : > { %v2897_v11 = vpop.permute.xlu1 %1022  ;;  %v2899_v47 = vpop.permute.xlu0 %1118 }
 0x252   : > { %v2901_v35 = vpop.permute.xlu1 %1120  ;;  %v497_v12 = vpop.permute.xlu0 %496 }
 0x253   : > { %v509_v33 = vsel %vm502_vm1, %v481_v8, %v497_v12  ;;  %v517_v40 = vsel %vm502_vm1, %v497_v12, %v481_v8  ;;  %v533_v8 = vld [vmem:[#allocation3 + $0x70] sm:$0xff] }
 0x254   : > { %v547_v25 = vmul.f32 %v531_v43, %v517_v40  ;;  %v548_v18 = vmul.f32 %v532_v13, %v509_v33  ;;  %v827_v12 = vld [vmem:[#allocation3 + $0x1f0] sm:$0xff] }
 0x256   : > { %v2903_v42 = vpop.permute.xlu1 %1218  ;;  %v596_v32 = vpop.permute.xlu0 %595 }
 0x257   : > { %v606_v44 = vsel %vm599_vm2, %v580_v27, %v596_v32  ;;  %v614_v45 = vsel %vm599_vm2, %v596_v32, %v580_v27  ;;  %v828_v32 = vld [vmem:[#allocation3 + $0x1f8] sm:$0xff] }
 0x258   : > { %v645_v28 = vmul.f32 %v629_v14, %v614_v45  ;;  %v646_v49 = vmul.f32 %v630_v61, %v606_v44  ;;  %v874_v44 = vld [vmem:[#allocation3 + $0x260] sm:$0xff]  ;;  %v875_v45 = vld [vmem:[#allocation3 + $0x268] sm:$0xff] }
 0x25a   : > { %v499_v57 = vpop.permute.xlu1 %498  ;;  %v694_v59 = vpop.permute.xlu0 %693  ;;  %v661_v41 = vadd.f32 %v645_v28, %v547_v25  ;;  %v662_v46 = vadd.f32 %v646_v49, %v548_v18  ;;  %v891_v28 = vmul.f32 %v875_v45, %v2653_v48 }
 0x25b   : > { %v704_v39 = vsel %vm697_vm3, %v678_v58, %v694_v59  ;;  %v712_v24 = vsel %vm697_vm3, %v694_v59, %v678_v58  ;;  %v510_v20 = vsel %vm502_vm1, %v483_v4, %v499_v57  ;;  %v518_v53 = vsel %vm502_vm1, %v499_v57, %v483_v4 }
 0x25c   : > { %v743_v60 = vmul.f32 %v727_v29, %v712_v24  ;;  %v744_v16 = vmul.f32 %v728_v0, %v704_v39  ;;  %v550_v4 = vmul.f32 %v534_v22, %v510_v20  ;;  %v890_v24 = vmul.f32 %v874_v44, %v2647_v9  ;;  %v974_v20 = vld [vmem:[#allocation3 + $0x2f0] sm:$0xff] }
 0x25e   : > { %v598_v5 = vpop.permute.xlu1 %597  ;;  %v792_v23 = vpop.permute.xlu0 %791  ;;  %v759_v57 = vadd.f32 %v743_v60, %v661_v41  ;;  %v760_v59 = vadd.f32 %v744_v16, %v662_v46  ;;  %v1070_v16 = vld [vmem:[#allocation3 + $0x360] sm:$0xff]  ;;  %v1169_v41 = vld [vmem:[#allocation3 + $0x3e8] sm:$0xff] }
 0x25f   : > { %v607_v10 = vsel %vm599_vm2, %v582_v54, %v598_v5  ;;  %v615_v52 = vsel %vm599_vm2, %v598_v5, %v582_v54  ;;  %v802_v36 = vsel %vm795_vm4, %v776_v37, %v792_v23  ;;  %v810_v62 = vsel %vm795_vm4, %v792_v23, %v776_v37 }
 0x260   : > { %v647_v26 = vmul.f32 %v631_v50, %v615_v52  ;;  %v648_v2 = vmul.f32 %v632_v7, %v607_v10  ;;  %v841_v54 = vmul.f32 %v825_v19, %v810_v62  ;;  %v842_v58 = vmul.f32 %v826_v21, %v802_v36  ;;  %v972_v7 = vld [vmem:[#allocation3 + $0x2e0] sm:$0xff]  ;;  %v973_v10 = vld [vmem:[#allocation3 + $0x2e8] sm:$0xff]  ;;  %v876_v19 = vld [vmem:[#allocation3 + $0x270] sm:$0xff] }
 0x261   : > { %v549_v37 = vmul.f32 %v533_v8, %v518_v53  ;;  %v877_v21 = vld [vmem:[#allocation3 + $0x278] sm:$0xff] }
 0x262   : > { %v696_v38 = vpop.permute.xlu1 %695  ;;  %v939_v17 = vpop.permute.xlu0 %938  ;;  %v664_v40 = vadd.f32 %v648_v2, %v550_v4  ;;  %v857_v23 = vadd.f32 %v841_v54, %v759_v57  ;;  %v858_v29 = vadd.f32 %v842_v58, %v760_v59  ;;  %v975_v53 = vld [vmem:[#allocation3 + $0x2f8] sm:$0xff]  ;;  %v892_v2 = vmul.f32 %v876_v19, %v2655_v63  ;;  %v1072_v54 = vld [vmem:[#allocation3 + $0x370] sm:$0xff] }
 0x263   : > { %v705_v30 = vsel %vm697_vm3, %v680_v56, %v696_v38  ;;  %v713_v27 = vsel %vm697_vm3, %v696_v38, %v680_v56  ;;  %v663_v33 = vadd.f32 %v647_v26, %v549_v37  ;;  %v949_v52 = vsel %vm942_vm5, %v2891_v1, %v939_v17  ;;  %v1071_v38 = vld [vmem:[#allocation3 + $0x368] sm:$0xff]  ;;  %v1073_v58 = vld [vmem:[#allocation3 + $0x378] sm:$0xff] }
 0x264   : > { %v745_v14 = vmul.f32 %v729_v55, %v713_v27  ;;  %v746_v61 = vmul.f32 %v730_v31, %v705_v30  ;;  %v906_v36 = vadd.f32 %v890_v24, %v857_v23  ;;  %v907_v9 = vadd.f32 %v891_v28, %v858_v29  ;;  %v1168_v31 = vld [vmem:[#allocation3 + $0x3e0] sm:$0xff]  ;;  %v1267_v23 = vld [vmem:[#allocation3 + $0x468] sm:$0xff] }
 0x265   : > { %v988_v8 = vmul.f32 %v972_v7, %v949_v52  ;;  %v893_v55 = vmul.f32 %v877_v21, %v2661_v51  ;;  %v1269_v52 = vld [vmem:[#allocation3 + $0x478] sm:$0xff] }
 0x266   : > { %v794_v43 = vpop.permute.xlu1 %793  ;;  %v1037_v13 = vpop.permute.xlu0 %1036  ;;  %v761_v49 = vadd.f32 %v745_v14, %v663_v33  ;;  %v762_v50 = vadd.f32 %v746_v61, %v664_v40  ;;  %v1170_v61 = vld [vmem:[#allocation3 + $0x3f0] sm:$0xff] }
 0x267   : > { %v803_v56 = vsel %vm795_vm4, %v2889_v34, %v794_v43  ;;  %v811_v5 = vsel %vm795_vm4, %v794_v43, %v2889_v34  ;;  %v957_v34 = vsel %vm942_vm5, %v939_v17, %v2891_v1  ;;  %v1047_v17 = vsel %vm1040_vm6, %v2895_v15, %v1037_v13 }
 0x268   : > { %v843_v0 = vmul.f32 %v827_v12, %v811_v5  ;;  %v844_v39 = vmul.f32 %v828_v32, %v803_v56  ;;  %v989_v22 = vmul.f32 %v973_v10, %v957_v34  ;;  %v1055_v26 = vsel %vm1040_vm6, %v1037_v13, %v2895_v15  ;;  %v1266_v5 = vld [vmem:[#allocation3 + $0x460] sm:$0xff]  ;;  %v1268_v10 = vld [vmem:[#allocation3 + $0x470] sm:$0xff] }
 0x269   : > { %v1004_v32 = vadd.f32 %v988_v8, %v906_v36  ;;  %v1086_v59 = vmul.f32 %v1070_v16, %v1047_v17  ;;  %v1087_v14 = vmul.f32 %v1071_v38, %v1055_v26  ;;  %v1302_v26 = vld [vmem:[%s3044_s2] sm:$0xff] }
 0x26a   : > { %v941_v25 = vpop.permute.xlu1 %940  ;;  %v1135_v18 = vpop.permute.xlu0 %1134  ;;  %v859_v62 = vadd.f32 %v843_v0, %v761_v49  ;;  %v860_v48 = vadd.f32 %v844_v39, %v762_v50  ;;  %v1005_v57 = vadd.f32 %v989_v22, %v907_v9 }
 0x26b   : > { %v950_v60 = vsel %vm942_vm5, %v2893_v3, %v941_v25  ;;  %v958_v1 = vsel %vm942_vm5, %v941_v25, %v2893_v3  ;;  %v1145_v3 = vsel %vm1138_vm7, %v2899_v47, %v1135_v18  ;;  %v1153_v46 = vsel %vm1138_vm7, %v1135_v18, %v2899_v47  ;;  %v1171_v47 = vld [vmem:[#allocation3 + $0x3f8] sm:$0xff] }
 0x26c   : > { %v908_v15 = vadd.f32 %v892_v2, %v859_v62  ;;  %v909_v37 = vadd.f32 %v893_v55, %v860_v48  ;;  %v990_v4 = vmul.f32 %v974_v20, %v950_v60  ;;  %v991_v12 = vmul.f32 %v975_v53, %v958_v1 }
 0x26d   : > { %v1184_v44 = vmul.f32 %v1168_v31, %v1145_v3  ;;  %v1185_v45 = vmul.f32 %v1169_v41, %v1153_v46  ;;  %v1102_v50 = vadd.f32 %v1086_v59, %v1004_v32  ;;  %v1103_v7 = vadd.f32 %v1087_v14, %v1005_v57 }
 0x26e   : > { %v1039_v30 = vpop.permute.xlu1 %1038  ;;  %v1217_v27 = vpop.permute.xlu0 %1216  ;;  %v1006_v39 = vadd.f32 %v990_v4, %v908_v15  ;;  %v1007_v24 = vadd.f32 %v991_v12, %v909_v37 }
 0x26f   : > { %v1048_v63 = vsel %vm1040_vm6, %v2897_v11, %v1039_v30  ;;  %v1056_v51 = vsel %vm1040_vm6, %v1039_v30, %v2897_v11  ;;  %v1200_v21 = vadd.f32 %v1184_v44, %v1102_v50  ;;  %v1201_v36 = vadd.f32 %v1185_v45, %v1103_v7 }
 0x270   : > { %v1088_v43 = vmul.f32 %v1072_v54, %v1048_v63  ;;  %v1089_v13 = vmul.f32 %v1073_v58, %v1056_v51 }
 0x272   : > { %v1137_v33 = vpop.permute.xlu1 %1136  ;;  %v1233_v40 = vpop.permute.xlu0 %1232  ;;  %v1104_v34 = vadd.f32 %v1088_v43, %v1006_v39  ;;  %v1105_v25 = vadd.f32 %v1089_v13, %v1007_v24 }
 0x273   : > { %v1146_v11 = vsel %vm1138_vm7, %v2901_v35, %v1137_v33  ;;  %v1154_v56 = vsel %vm1138_vm7, %v1137_v33, %v2901_v35  ;;  %v1243_v29 = vsel %vm1236_vm8, %v1217_v27, %v1233_v40  ;;  %v1251_v0 = vsel %vm1236_vm8, %v1233_v40, %v1217_v27 }
 0x274   : > { %v1186_v28 = vmul.f32 %v1170_v61, %v1146_v11  ;;  %v1187_v49 = vmul.f32 %v1171_v47, %v1154_v56  ;;  %v1282_v18 = vmul.f32 %v1266_v5, %v1243_v29  ;;  %v1283_v35 = vmul.f32 %v1267_v23, %v1251_v0 }
 0x276   : > { %v1235_v19 = vpop.permute.xlu1 %1234  ;;  %v1202_v48 = vadd.f32 %v1186_v28, %v1104_v34  ;;  %v1203_v8 = vadd.f32 %v1187_v49, %v1105_v25  ;;  %v1298_v53 = vadd.f32 %v1282_v18, %v1200_v21  ;;  %v1299_v60 = vadd.f32 %v1283_v35, %v1201_v36 }
 0x277   : > { %v1244_v9 = vsel %vm1236_vm8, %v2903_v42, %v1235_v19  ;;  %v1252_v62 = vsel %vm1236_vm8, %v1235_v19, %v2903_v42 }
 0x278   : > { %v1284_v22 = vmul.f32 %v1268_v10, %v1244_v9  ;;  %v1285_v20 = vmul.f32 %v1269_v52, %v1252_v62 }
 0x27a   : > { %v1300_v1 = vadd.f32 %v1284_v22, %v1202_v48  ;;  %v1301_v16 = vadd.f32 %v1285_v20, %v1203_v8 }
 0x27c   : > { %v1579_v38 = vpack.c.bf16 %v1301_v16, %v1299_v60  ;;  %v1581_v17 = vpack.c.bf16 %v1300_v1, %v1298_v53 }
 0x27e   : > { %1580 = vmatprep.subr.bf16.mxu1 %v1579_v38 }
 0x27f   : > { %1582 = vmatpush1.bf16.msra.mxu1 %v1581_v17 }
 0x282   : > { %1539 = vmatmul.mubr.msk.f32.vlgmr.msra.gmra.mrb[0].mxu1 %vm366_vm0, %v1302_v26 }
 0x355   : > { %v1374_v42 = vpop.f32.mrb[0].mxu1 }
 0x356   : > { %v1375_v2 = vadd.f32 %v1374_v42, %v1304_v6  ;;  %v1376_v55 = vpop.f32.mrb[1].mxu1 }
 0x357   : > { %v1377_v31 = vadd.f32 %v1376_v55, %v1304_v6 }
 0x358   : > { %v1540_v30 = vmul.f32 -1.442695, %v1375_v2 }
 0x359   : > { %v1541_v27 = vmul.f32 -1.442695, %v1377_v31 }
 0x35a   : > { %1668 = vpow2.f32 %v1540_v30 }
 0x35b   : > { %1670 = vpow2.f32 %v1541_v27 }
 0x364   : > { %v1669_v41 = vpop.eup %1668 }
 0x365   : > { %v1671_v3 = vpop.eup %1670  ;;  %v1385_v46 = vadd.f32 1.0, %v1669_v41 }
 0x366   : > { %v1386_v54 = vadd.f32 1.0, %v1671_v3 }
 0x367   : > { %1672 = vrcp.f32 %v1385_v46 }
 0x368   : > { %1674 = vrcp.f32 %v1386_v54 }
 0x371   : > { %v1673_v58 = vpop.eup %1672 }
 0x372   : > { %v1675_v63 = vpop.eup %1674  ;;  %1391 = vst [vmem:[%s335_s19] sm:$0xff] %v1673_v58 }
 0x373   : > { %1392 = vst [vmem:[%s335_s19 + $0x8] sm:$0xff] %v1675_v63 }
 0x374   : > { %1805 = shalt.err (!%p1802_p4)
}
 0x375   : > { %s1806_s17 = scalar_lea.hbm %s2998_s9, 256  ;;  %s1810_s29 = scalar_lea.hbm %s3048_s6, 512 }
 0x376   : > { %p1807_p2 = scmp.ne.s32.totalorder %s2998_s9, %s1806_s17  ;;  %p1811_p13 = scmp.lt.u32.totalorder %s2998_s9, %s3048_s6 }
 0x377   : > { %p1812_p3 = scmp.lt.u32.totalorder %s1810_s29, %s1806_s17  ;;  %p1814_p7 = scmp.lt.u32.totalorder %s1806_s17, %s2998_s9 }
 0x378   : > { %p1808_p6 = pnand %p1807_p2, %p3117_p9 }
 0x379   : > { %p1813_p12 = por %p1812_p3, %p1811_p13 }
 0x37a   : > { %p1809_p5 = pneg %p1808_p6 }
 0x37b   : > { %p1815_p0 = por %p1814_p7, %p1813_p12 }
 0x37d   : > { %p1816_p11 = pnand %p1815_p0, %p1809_p5 }
 0x37f   : > { %1819 = shalt.err (!%p1816_p11)
}
 0x380   : > { %1595 = dma.vmem_to_hbm [thread:$0]  (%p3117_p9), %s3000_s12, 256, %s2998_s9, %s1394_s16  }
 0x381 PF: > { %s1420_s7 = sand.u32 1, %s1854_s23   ;;  %p3118_p8 = scmp.ne.s32.totalorder %s3078_s11, 0 }
 0x382   : > { %p3119_p10 = scmp.ge.s32.totalorder %s1866_s26, 2  ;;  %s1421_s0 = scalar_lea.sflag [#allocation5], %s1420_s7 }
 0x384   : > { %p1612_p1 = pnand %p3119_p10, %p3118_p8 }
 0x386   : > { %1849 = dma.done.wait (!%p1612_p1), %s1421_s0, 256  }
 0x387   : > { %1851 = vsyncadd (!%p1612_p1), %s1421_s0, 4294967040  ;;  %s3120_s26 = sld [smem:[#allocation15_spill]]  ;;  %s3121_s4 = sld [smem:[#allocation16_spill]] }
 0x388   : > { %s3122_s23 = smov %s1858_s24  ;;  %s3123_s24 = smov %s1862_s25 }
 0x38d   : > { %p19_p4 = scmp.ge.s32.totalorder %s3120_s26, 4   ;;  %s3124_s25 = smov %s3121_s4 }
 0x38f   :  { %21 = sbr.rel (!%p19_p4) target bundleno = 9 (0x9), region = 115 }
 0x396   :  { %1426 = vsyncpa [#allocation4], 1 }
 0x397   :  { %1428 = vsyncpa [#allocation4 + $0x1], 1 }
 0x398   :  { %1429 = vsyncpa [#allocation7], 1 }
 0x399   :  { %1430 = vsyncpa [#allocation5], 1 }
 0x39a   :  { %1432 = vsyncpa [#allocation5 + $0x1], 1 }

</bundles_post_ra>
